<compile_context>
chip_gen: v7x
topology: tpu7x:2x2x1
jax: 0.10.0
libtpu: 0.0.40
codegen_flags: <defaults>
</compile_context>

<pallas_src>
import functools
import math

import jax
import jax.numpy as jnp
from jax.experimental import pallas as pl
from jax.experimental.pallas import tpu as pltpu

_MIB = 1024 * 1024


# ----------------------------------------------------------------------------
# Fused encoder-layer kernel (one batch tile of Bb sequences per grid step)
# ----------------------------------------------------------------------------
def _encoder_layer_kernel(x_ref,
                          g1_ref, be1_ref,
                          wqkv_ref, bqkv_ref,
                          wo_ref, bo_ref,
                          g2_ref, be2_ref,
                          w1_ref, b1_ref,
                          w2_ref, b2_ref,
                          o_ref,
                          *, num_heads):
    Bb, S, E = x_ref.shape
    N = Bb * S
    H = num_heads
    Dh = E // H
    scale = 1.0 / math.sqrt(Dh)

    # Flatten the batch tile to (N, E): LN + every dense matmul sees a tall M.
    x = x_ref[...].astype(jnp.float32).reshape(N, E)

    # ---- LayerNorm1 (biased variance, eps=1e-5, like nn.LayerNorm) ----
    mu = jnp.mean(x, axis=-1, keepdims=True)
    var = jnp.mean((x - mu) ** 2, axis=-1, keepdims=True)
    xn = (x - mu) * jax.lax.rsqrt(var + 1e-5)
    xn = xn * g1_ref[...] + be1_ref[...]                                  # (N, E) f32

    # ---- fused QKV projection: bf16 MXU, f32 accumulation ----
    qkv = jnp.dot(xn.astype(jnp.bfloat16), wqkv_ref[...],
                  preferred_element_type=jnp.float32) + bqkv_ref[...]     # (N, 3E) f32

    # Fold the 1/sqrt(Dh) scale into q, then downcast q/k/v to bf16 right away
    # (they only ever feed bf16 MXU matmuls; no f32 copies live in the loop).
    q = (qkv[:, :E] * scale).astype(jnp.bfloat16).reshape(Bb, S, E)
    k = qkv[:, E:2 * E].astype(jnp.bfloat16).reshape(Bb, S, E)
    v = qkv[:, 2 * E:].astype(jnp.bfloat16).reshape(Bb, S, E)

    # ---- multi-head attention with per-head folded output projection ----
    # attn @ Wo == sum_h  oh @ Wo[h*Dh:(h+1)*Dh, :]; accumulating per head
    # avoids the attention scratch slab and all masked lane-offset stores.
    y = x + bo_ref[...]                                                   # (N, E) f32
    for h in range(H):
        lo = h * Dh
        hi = lo + Dh
        qh = q[:, :, lo:hi]                                               # (Bb, S, Dh) bf16
        kh = k[:, :, lo:hi]
        vh = v[:, :, lo:hi]
        # Batched score matmul; contraction over the last dim avoids any .T.
        s = jnp.einsum("bqd,bkd->bqk", qh, kh,
                       preferred_element_type=jnp.float32)                # (Bb, S, S)
        s = s - jnp.max(s, axis=-1, keepdims=True)
        p = jnp.exp(s)
        p = p * pl.reciprocal(jnp.sum(p, axis=-1, keepdims=True), approx=True)
        oh = jnp.einsum("bqk,bkd->bqd", p.astype(jnp.bfloat16), vh,
                        preferred_element_type=jnp.float32)               # (Bb, S, Dh)
        # Per-head slice of Wo rows is a static, full-lane sublane slice.
        y = y + jnp.dot(oh.reshape(N, Dh).astype(jnp.bfloat16),
                        wo_ref[lo:hi, :],
                        preferred_element_type=jnp.float32)
    # TODO(synk): for large H*S, replace this unrolled per-head loop with a
    # head-batched / flash-style (online-softmax, KV-tiled) loop to bound
    # unroll, live ranges and the O(Bb*S^2) score memory.

    # ---- LayerNorm2 ----
    mu2 = jnp.mean(y, axis=-1, keepdims=True)
    var2 = jnp.mean((y - mu2) ** 2, axis=-1, keepdims=True)
    yn = (y - mu2) * jax.lax.rsqrt(var2 + 1e-5)
    yn = yn * g2_ref[...] + be2_ref[...]

    # ---- MLP: Linear -> tanh-GELU (EUP) -> Linear (bf16 MXU, f32 acc) ----
    h1 = jnp.dot(yn.astype(jnp.bfloat16), w1_ref[...],
                 preferred_element_type=jnp.float32) + b1_ref[...]        # (N, Hm)
    h1 = jax.nn.gelu(h1, approximate=True)   # tanh form -> EUP; erf parity not required
    out = jnp.dot(h1.astype(jnp.bfloat16), w2_ref[...],
                  preferred_element_type=jnp.float32) + b2_ref[...]       # (N, E)
    # TODO(synk): dropout=0.0 in this config -> identity; nonzero dropout not implemented.

    o_ref[...] = (y + out).reshape(Bb, S, E).astype(o_ref.dtype)


# ----------------------------------------------------------------------------
# Generation-aware sizing helpers
# ----------------------------------------------------------------------------
def _tpu_vmem_capacity_bytes(default=64 * _MIB):
    """Per-core VMEM capacity; conservative 64 MiB fallback (fits every gen)."""
    try:
        info = pltpu.get_tpu_info()
        cap = getattr(info, "vmem_capacity_bytes", None)
        return int(cap) if cap else default
    except Exception:
        return default


def _pick_batch_block(B, S, vmem_cap):
    """Largest divisor Bb of B such that:
       * Bb*S <= target_rows (fill the MXU M dim; bigger on 128-MiB parts),
       * the grid keeps >=2 steps when B>=2 (v7x has 2 TensorCores),
       * per-head f32 score+prob tensors (2*Bb*S^2*4 B) stay <= 4 MiB."""
    target_rows = 512 if vmem_cap >= 100 * _MIB else 256
    bb_cap = max(1, B // 2)
    best = 1
    for cand in range(1, B + 1):
        if B % cand or cand > bb_cap:
            continue
        if cand * S > target_rows:
            continue
        if 2 * cand * S * S * 4 > 4 * _MIB:
            continue
        best = cand
    return best


def _resident_spec(shape):
    """Weights/biases: constant block index -> fetched once; request a single
    VMEM buffer so the pipeline doesn't double-buffer bytes that never change."""
    index_map = lambda b: (0,) * len(shape)
    try:
        return pl.BlockSpec(shape, index_map, pipeline_mode=pl.Buffered(1))
    except Exception:  # older Pallas without pipeline_mode/Buffered
        return pl.BlockSpec(shape, index_map)


# ----------------------------------------------------------------------------
# Wrapper
# ----------------------------------------------------------------------------
def transformer_encoder_forward(x, params, num_heads):
    B, S, E = x.shape
    Hm = params["w1"].shape[1]

    vmem_cap = _tpu_vmem_capacity_bytes()
    vmem_limit = max(32 * _MIB, min(96 * _MIB, (vmem_cap * 3) // 4))
    Bb = _pick_batch_block(B, S, vmem_cap)
    grid = (B // Bb,)

    # Resident weights in bf16: bf16-native MXU + half the VMEM/DMA bytes.
    bf16 = jnp.bfloat16
    wqkv = params["wqkv"].astype(bf16)
    wo = params["wo"].astype(bf16)
    w1 = params["w1"].astype(bf16)
    w2 = params["w2"].astype(bf16)
    # TODO(synk): on v7x with E>=2048, store weights as fp8 + per-channel scales
    # (bf16 weights alone would exceed the 64 MiB/TC VMEM).
    # TODO(synk): E/Hm not multiples of 128 (like this demo) should be padded in
    # the wrapper (with masked LayerNorm/softmax) to get full MXU/lane tiles.

    x_spec = pl.BlockSpec((Bb, S, E), lambda b: (b, 0, 0))
    kernel = functools.partial(_encoder_layer_kernel, num_heads=num_heads)

    args = (x,
            params["g1"], params["b1"],
            wqkv, params["bqkv"],
            wo, params["bo"],
            params["g2"], params["b2"],
            w1, params["b1_mlp"],
            w2, params["b2_mlp"])

    def build(single_buffer_weights):
        res = _resident_spec if single_buffer_weights else (
            lambda s: pl.BlockSpec(s, lambda b: (0,) * len(s)))
        return pl.pallas_call(
            kernel,
            out_shape=jax.ShapeDtypeStruct((B, S, E), x.dtype),
            grid=grid,
            in_specs=[
                x_spec,
                res((1, E)), res((1, E)),            # LayerNorm1 gamma/beta (f32)
                res((E, 3 * E)), res((1, 3 * E)),    # Wqkv (bf16), bqkv (f32)
                res((E, E)), res((1, E)),            # Wo (bf16), bo (f32)
                res((1, E)), res((1, E)),            # LayerNorm2 gamma/beta (f32)
                res((E, Hm)), res((1, Hm)),          # W1 (bf16), b1 (f32)
                res((Hm, E)), res((1, E)),           # W2 (bf16), b2 (f32)
            ],
            out_specs=x_spec,
            compiler_params=pltpu.CompilerParams(
                dimension_semantics=("parallel",),
                vmem_limit_bytes=int(vmem_limit),
            ),
        )

    try:
        return build(True)(*args)
    except Exception:
        # This JAX build rejected single-buffered resident weights at lowering:
        # fall back to default double-buffering (correct, just more VMEM).
        return build(False)(*args)


# ----------------------------------------------------------------------------
# Pure-JAX reference (mirrors the PyTorch forward, f32 throughout, exact GELU)
# ----------------------------------------------------------------------------
def reference_forward(x, params, num_heads):
    B, S, E = x.shape
    Dh = E // num_heads

    def ln(v, g, b):
        mu = jnp.mean(v, axis=-1, keepdims=True)
        var = jnp.mean((v - mu) ** 2, axis=-1, keepdims=True)
        return (v - mu) / jnp.sqrt(var + 1e-5) * g + b

    xn = ln(x, params["g1"][0], params["b1"][0])
    qkv = xn @ params["wqkv"] + params["bqkv"][0]
    q, k, v = jnp.split(qkv, 3, axis=-1)
    q = q.reshape(B, S, num_heads, Dh).transpose(0, 2, 1, 3)
    k = k.reshape(B, S, num_heads, Dh).transpose(0, 2, 1, 3)
    v = v.reshape(B, S, num_heads, Dh).transpose(0, 2, 1, 3)
    s = jnp.einsum("bhqd,bhkd->bhqk", q, k) / math.sqrt(Dh)
    p = jax.nn.softmax(s, axis=-1)
    a = jnp.einsum("bhqk,bhkd->bhqd", p, v).transpose(0, 2, 1, 3).reshape(B, S, E)
    y = x + (a @ params["wo"] + params["bo"][0])

    yn = ln(y, params["g2"][0], params["b2"][0])
    h = jax.nn.gelu(yn @ params["w1"] + params["b1_mlp"][0], approximate=False)
    z = y + (h @ params["w2"] + params["b2_mlp"][0])
    return z


# ----------------------------------------------------------------------------
# Deterministic parameter construction + run
# ----------------------------------------------------------------------------
def make_params(key, embed_dim, mlp_ratio=4.0):
    E = embed_dim
    Hm = int(E * mlp_ratio)
    ks = jax.random.split(key, 8)
    f32 = jnp.float32
    return {
        # LayerNorm1 / LayerNorm2
        "g1": jnp.ones((1, E), f32),
        "b1": jnp.zeros((1, E), f32),
        "g2": jnp.ones((1, E), f32),
        "b2": jnp.zeros((1, E), f32),
        # MultiheadAttention in_proj, stored (E, 3E) = transpose of torch (3E, E)
        "wqkv": 0.02 * jax.random.normal(ks[0], (E, 3 * E), f32),
        "bqkv": 0.02 * jax.random.normal(ks[1], (1, 3 * E), f32),
        # MultiheadAttention out_proj
        "wo": 0.02 * jax.random.normal(ks[2], (E, E), f32),
        "bo": 0.02 * jax.random.normal(ks[3], (1, E), f32),
        # MLP
        "w1": 0.02 * jax.random.normal(ks[4], (E, Hm), f32),
        "b1_mlp": 0.02 * jax.random.normal(ks[5], (1, Hm), f32),
        "w2": 0.02 * jax.random.normal(ks[6], (Hm, E), f32),
        "b2_mlp": 0.02 * jax.random.normal(ks[7], (1, E), f32),
    }


if __name__ == "__main__":
    B, S, E = 2, 8, 32
    num_heads = 4

    key = jax.random.PRNGKey(0)
    kx, kp = jax.random.split(key)
    x = jax.random.normal(kx, (B, S, E), jnp.float32)
    params = make_params(kp, E)

    out = transformer_encoder_forward(x, params, num_heads)
    out = jax.block_until_ready(out)

    ref = reference_forward(x, params, num_heads)
    assert out.shape == (B, S, E)
    # bf16 matmul inputs + approx reciprocal + tanh-GELU -> relaxed tolerance.
    assert jnp.allclose(out, ref, atol=2e-2, rtol=2e-2), "mismatch vs reference"

    print("KERNEL_OK")
</pallas_src>

<mosaic_0001>
module attributes {stable_mosaic.version = 11 : i64} {
  func.func @_encoder_layer_kernel(%arg0: i32, %arg1: memref<1x8x32xf32, #tpu.memory_space<vmem>>, %arg2: memref<1x32xf32, #tpu.memory_space<vmem>>, %arg3: memref<1x32xf32, #tpu.memory_space<vmem>>, %arg4: memref<32x96xbf16, #tpu.memory_space<vmem>>, %arg5: memref<1x96xf32, #tpu.memory_space<vmem>>, %arg6: memref<32x32xbf16, #tpu.memory_space<vmem>>, %arg7: memref<1x32xf32, #tpu.memory_space<vmem>>, %arg8: memref<1x32xf32, #tpu.memory_space<vmem>>, %arg9: memref<1x32xf32, #tpu.memory_space<vmem>>, %arg10: memref<32x128xbf16, #tpu.memory_space<vmem>>, %arg11: memref<1x128xf32, #tpu.memory_space<vmem>>, %arg12: memref<128x32xbf16, #tpu.memory_space<vmem>>, %arg13: memref<1x32xf32, #tpu.memory_space<vmem>>, %arg14: memref<1x8x32xf32, #tpu.memory_space<vmem>>) attributes {dimension_semantics = [#tpu.dimension_semantics<parallel>], iteration_bounds = array<i64: 2>, scalar_prefetch = 0 : i64, scratch_operands = 0 : i64, tpu.core_type = #tpu.core_type<tc>, window_params = [{transform_indices = @transform_0, window_bounds = array<i64: 1, 8, 32>}, {pipeline_mode = #tpu.pipeline_mode<synchronous>, transform_indices = @transform_1, window_bounds = array<i64: 1, 32>}, {pipeline_mode = #tpu.pipeline_mode<synchronous>, transform_indices = @transform_2, window_bounds = array<i64: 1, 32>}, {pipeline_mode = #tpu.pipeline_mode<synchronous>, transform_indices = @transform_3, window_bounds = array<i64: 32, 96>}, {pipeline_mode = #tpu.pipeline_mode<synchronous>, transform_indices = @transform_4, window_bounds = array<i64: 1, 96>}, {pipeline_mode = #tpu.pipeline_mode<synchronous>, transform_indices = @transform_5, window_bounds = array<i64: 32, 32>}, {pipeline_mode = #tpu.pipeline_mode<synchronous>, transform_indices = @transform_6, window_bounds = array<i64: 1, 32>}, {pipeline_mode = #tpu.pipeline_mode<synchronous>, transform_indices = @transform_7, window_bounds = array<i64: 1, 32>}, {pipeline_mode = #tpu.pipeline_mode<synchronous>, transform_indices = @transform_8, window_bounds = array<i64: 1, 32>}, {pipeline_mode = #tpu.pipeline_mode<synchronous>, transform_indices = @transform_9, window_bounds = array<i64: 32, 128>}, {pipeline_mode = #tpu.pipeline_mode<synchronous>, transform_indices = @transform_10, window_bounds = array<i64: 1, 128>}, {pipeline_mode = #tpu.pipeline_mode<synchronous>, transform_indices = @transform_11, window_bounds = array<i64: 128, 32>}, {pipeline_mode = #tpu.pipeline_mode<synchronous>, transform_indices = @transform_12, window_bounds = array<i64: 1, 32>}, {transform_indices = @transform_13, window_bounds = array<i64: 1, 8, 32>}]} {
    %c0 = arith.constant 0 : index
    %c0_0 = arith.constant 0 : index
    %c0_1 = arith.constant 0 : index
    %0 = vector.load %arg1[%c0, %c0_0, %c0_1] : memref<1x8x32xf32, #tpu.memory_space<vmem>>, vector<1x8x32xf32>
    %1 = vector.shape_cast %0 : vector<1x8x32xf32> to vector<8x32xf32>
    %cst = arith.constant dense<0.000000e+00> : vector<8xf32>
    %2 = vector.multi_reduction <add>, %1, %cst [1] : vector<8x32xf32> to vector<8xf32>
    %3 = vector.shape_cast %2 : vector<8xf32> to vector<8x1xf32>
    %cst_2 = arith.constant 3.200000e+01 : f32
    %4 = vector.broadcast %cst_2 : f32 to vector<8x1xf32>
    %5 = arith.divf %3, %4 : vector<8x1xf32>
    %6 = vector.broadcast %5 : vector<8x1xf32> to vector<8x32xf32>
    %7 = arith.subf %1, %6 : vector<8x32xf32>
    %8 = arith.mulf %7, %7 : vector<8x32xf32>
    %cst_3 = arith.constant dense<0.000000e+00> : vector<8xf32>
    %9 = vector.multi_reduction <add>, %8, %cst_3 [1] : vector<8x32xf32> to vector<8xf32>
    %10 = vector.shape_cast %9 : vector<8xf32> to vector<8x1xf32>
    %cst_4 = arith.constant 3.200000e+01 : f32
    %11 = vector.broadcast %cst_4 : f32 to vector<8x1xf32>
    %12 = arith.divf %10, %11 : vector<8x1xf32>
    %13 = vector.broadcast %5 : vector<8x1xf32> to vector<8x32xf32>
    %14 = arith.subf %1, %13 : vector<8x32xf32>
    %cst_5 = arith.constant 9.99999974E-6 : f32
    %15 = vector.broadcast %cst_5 : f32 to vector<8x1xf32>
    %16 = arith.addf %12, %15 : vector<8x1xf32>
    %17 = math.rsqrt %16 : vector<8x1xf32>
    %18 = vector.broadcast %17 : vector<8x1xf32> to vector<8x32xf32>
    %19 = arith.mulf %14, %18 : vector<8x32xf32>
    %c0_6 = arith.constant 0 : index
    %c0_7 = arith.constant 0 : index
    %20 = vector.load %arg2[%c0_6, %c0_7] : memref<1x32xf32, #tpu.memory_space<vmem>>, vector<1x32xf32>
    %21 = vector.broadcast %20 : vector<1x32xf32> to vector<8x32xf32>
    %22 = arith.mulf %19, %21 : vector<8x32xf32>
    %c0_8 = arith.constant 0 : index
    %c0_9 = arith.constant 0 : index
    %23 = vector.load %arg3[%c0_8, %c0_9] : memref<1x32xf32, #tpu.memory_space<vmem>>, vector<1x32xf32>
    %24 = vector.broadcast %23 : vector<1x32xf32> to vector<8x32xf32>
    %25 = arith.addf %22, %24 : vector<8x32xf32>
    %26 = arith.truncf %25 : vector<8x32xf32> to vector<8x32xbf16>
    %c0_10 = arith.constant 0 : index
    %c0_11 = arith.constant 0 : index
    %27 = vector.load %arg4[%c0_10, %c0_11] : memref<32x96xbf16, #tpu.memory_space<vmem>>, vector<32x96xbf16>
    %cst_12 = arith.constant dense<0.000000e+00> : vector<8x96xf32>
    %28 = tpu.matmul %26, %27, %cst_12 {dimension_numbers = #tpu.dot_dimension_numbers<[1], [0], [0], [1], [0, 0, 1, 1], [], []>} : vector<8x32xbf16>, vector<32x96xbf16>, vector<8x96xf32> -> vector<8x96xf32>
    %c0_13 = arith.constant 0 : index
    %c0_14 = arith.constant 0 : index
    %29 = vector.load %arg5[%c0_13, %c0_14] : memref<1x96xf32, #tpu.memory_space<vmem>>, vector<1x96xf32>
    %30 = vector.broadcast %29 : vector<1x96xf32> to vector<8x96xf32>
    %31 = arith.addf %28, %30 : vector<8x96xf32>
    %32 = vector.extract_strided_slice %31 {offsets = [0, 0], sizes = [8, 32], strides = [1, 1]} : vector<8x96xf32> to vector<8x32xf32>
    %cst_15 = arith.constant 0.353553385 : f32
    %33 = vector.broadcast %cst_15 : f32 to vector<8x32xf32>
    %34 = arith.mulf %32, %33 : vector<8x32xf32>
    %35 = arith.truncf %34 : vector<8x32xf32> to vector<8x32xbf16>
    %36 = vector.shape_cast %35 : vector<8x32xbf16> to vector<1x8x32xbf16>
    %37 = vector.extract_strided_slice %31 {offsets = [0, 32], sizes = [8, 32], strides = [1, 1]} : vector<8x96xf32> to vector<8x32xf32>
    %38 = arith.truncf %37 : vector<8x32xf32> to vector<8x32xbf16>
    %39 = vector.shape_cast %38 : vector<8x32xbf16> to vector<1x8x32xbf16>
    %40 = vector.extract_strided_slice %31 {offsets = [0, 64], sizes = [8, 32], strides = [1, 1]} : vector<8x96xf32> to vector<8x32xf32>
    %41 = arith.truncf %40 : vector<8x32xf32> to vector<8x32xbf16>
    %42 = vector.shape_cast %41 : vector<8x32xbf16> to vector<1x8x32xbf16>
    %c0_16 = arith.constant 0 : index
    %c0_17 = arith.constant 0 : index
    %43 = vector.load %arg7[%c0_16, %c0_17] : memref<1x32xf32, #tpu.memory_space<vmem>>, vector<1x32xf32>
    %44 = vector.broadcast %43 : vector<1x32xf32> to vector<8x32xf32>
    %45 = arith.addf %1, %44 : vector<8x32xf32>
    %46 = vector.extract_strided_slice %36 {offsets = [0, 0, 0], sizes = [1, 8, 8], strides = [1, 1, 1]} : vector<1x8x32xbf16> to vector<1x8x8xbf16>
    %47 = vector.extract_strided_slice %39 {offsets = [0, 0, 0], sizes = [1, 8, 8], strides = [1, 1, 1]} : vector<1x8x32xbf16> to vector<1x8x8xbf16>
    %48 = vector.extract_strided_slice %42 {offsets = [0, 0, 0], sizes = [1, 8, 8], strides = [1, 1, 1]} : vector<1x8x32xbf16> to vector<1x8x8xbf16>
    "tpu.trace_start"() <{level = 10 : i32, message = "bqd,bkd->bqk"}> : () -> ()
    %cst_18 = arith.constant dense<0.000000e+00> : vector<1x8x8xf32>
    %49 = tpu.matmul %46, %47, %cst_18 {dimension_numbers = #tpu.dot_dimension_numbers<[2], [2], [1], [1], [0, 0, 0, 1, 1, 1], [0], [0]>} : vector<1x8x8xbf16>, vector<1x8x8xbf16>, vector<1x8x8xf32> -> vector<1x8x8xf32>
    "tpu.trace_stop"() : () -> ()
    %cst_19 = arith.constant dense<0xFF800000> : vector<1x8xf32>
    %50 = vector.multi_reduction <maximumf>, %49, %cst_19 [2] : vector<1x8x8xf32> to vector<1x8xf32>
    %51 = vector.shape_cast %50 : vector<1x8xf32> to vector<1x8x1xf32>
    %52 = vector.broadcast %51 : vector<1x8x1xf32> to vector<1x8x8xf32>
    %53 = arith.subf %49, %52 : vector<1x8x8xf32>
    %54 = math.exp %53 : vector<1x8x8xf32>
    %cst_20 = arith.constant dense<0.000000e+00> : vector<1x8xf32>
    %55 = vector.multi_reduction <add>, %54, %cst_20 [2] : vector<1x8x8xf32> to vector<1x8xf32>
    %56 = vector.shape_cast %55 : vector<1x8xf32> to vector<1x8x1xf32>
    %57 = tpu.reciprocal %56 {approx = true} : vector<1x8x1xf32> -> vector<1x8x1xf32>
    %58 = vector.broadcast %57 : vector<1x8x1xf32> to vector<1x8x8xf32>
    %59 = arith.mulf %54, %58 : vector<1x8x8xf32>
    %60 = arith.truncf %59 : vector<1x8x8xf32> to vector<1x8x8xbf16>
    "tpu.trace_start"() <{level = 10 : i32, message = "bqk,bkd->bqd"}> : () -> ()
    %cst_21 = arith.constant dense<0.000000e+00> : vector<1x8x8xf32>
    %61 = tpu.matmul %60, %48, %cst_21 {dimension_numbers = #tpu.dot_dimension_numbers<[2], [1], [1], [2], [0, 0, 0, 1, 1, 2], [0], [0]>} : vector<1x8x8xbf16>, vector<1x8x8xbf16>, vector<1x8x8xf32> -> vector<1x8x8xf32>
    "tpu.trace_stop"() : () -> ()
    %62 = vector.shape_cast %61 : vector<1x8x8xf32> to vector<8x8xf32>
    %63 = arith.truncf %62 : vector<8x8xf32> to vector<8x8xbf16>
    %c0_22 = arith.constant 0 : index
    %c0_23 = arith.constant 0 : index
    %64 = vector.load %arg6[%c0_22, %c0_23] : memref<32x32xbf16, #tpu.memory_space<vmem>>, vector<8x32xbf16>
    %cst_24 = arith.constant dense<0.000000e+00> : vector<8x32xf32>
    %65 = tpu.matmul %63, %64, %cst_24 {dimension_numbers = #tpu.dot_dimension_numbers<[1], [0], [0], [1], [0, 0, 1, 1], [], []>} : vector<8x8xbf16>, vector<8x32xbf16>, vector<8x32xf32> -> vector<8x32xf32>
    %66 = arith.addf %45, %65 : vector<8x32xf32>
    %67 = vector.extract_strided_slice %36 {offsets = [0, 0, 8], sizes = [1, 8, 8], strides = [1, 1, 1]} : vector<1x8x32xbf16> to vector<1x8x8xbf16>
    %68 = vector.extract_strided_slice %39 {offsets = [0, 0, 8], sizes = [1, 8, 8], strides = [1, 1, 1]} : vector<1x8x32xbf16> to vector<1x8x8xbf16>
    %69 = vector.extract_strided_slice %42 {offsets = [0, 0, 8], sizes = [1, 8, 8], strides = [1, 1, 1]} : vector<1x8x32xbf16> to vector<1x8x8xbf16>
    "tpu.trace_start"() <{level = 10 : i32, message = "bqd,bkd->bqk"}> : () -> ()
    %cst_25 = arith.constant dense<0.000000e+00> : vector<1x8x8xf32>
    %70 = tpu.matmul %67, %68, %cst_25 {dimension_numbers = #tpu.dot_dimension_numbers<[2], [2], [1], [1], [0, 0, 0, 1, 1, 1], [0], [0]>} : vector<1x8x8xbf16>, vector<1x8x8xbf16>, vector<1x8x8xf32> -> vector<1x8x8xf32>
    "tpu.trace_stop"() : () -> ()
    %cst_26 = arith.constant dense<0xFF800000> : vector<1x8xf32>
    %71 = vector.multi_reduction <maximumf>, %70, %cst_26 [2] : vector<1x8x8xf32> to vector<1x8xf32>
    %72 = vector.shape_cast %71 : vector<1x8xf32> to vector<1x8x1xf32>
    %73 = vector.broadcast %72 : vector<1x8x1xf32> to vector<1x8x8xf32>
    %74 = arith.subf %70, %73 : vector<1x8x8xf32>
    %75 = math.exp %74 : vector<1x8x8xf32>
    %cst_27 = arith.constant dense<0.000000e+00> : vector<1x8xf32>
    %76 = vector.multi_reduction <add>, %75, %cst_27 [2] : vector<1x8x8xf32> to vector<1x8xf32>
    %77 = vector.shape_cast %76 : vector<1x8xf32> to vector<1x8x1xf32>
    %78 = tpu.reciprocal %77 {approx = true} : vector<1x8x1xf32> -> vector<1x8x1xf32>
    %79 = vector.broadcast %78 : vector<1x8x1xf32> to vector<1x8x8xf32>
    %80 = arith.mulf %75, %79 : vector<1x8x8xf32>
    %81 = arith.truncf %80 : vector<1x8x8xf32> to vector<1x8x8xbf16>
    "tpu.trace_start"() <{level = 10 : i32, message = "bqk,bkd->bqd"}> : () -> ()
    %cst_28 = arith.constant dense<0.000000e+00> : vector<1x8x8xf32>
    %82 = tpu.matmul %81, %69, %cst_28 {dimension_numbers = #tpu.dot_dimension_numbers<[2], [1], [1], [2], [0, 0, 0, 1, 1, 2], [0], [0]>} : vector<1x8x8xbf16>, vector<1x8x8xbf16>, vector<1x8x8xf32> -> vector<1x8x8xf32>
    "tpu.trace_stop"() : () -> ()
    %83 = vector.shape_cast %82 : vector<1x8x8xf32> to vector<8x8xf32>
    %84 = arith.truncf %83 : vector<8x8xf32> to vector<8x8xbf16>
    %c8 = arith.constant 8 : index
    %c0_29 = arith.constant 0 : index
    %85 = vector.load %arg6[%c8, %c0_29] : memref<32x32xbf16, #tpu.memory_space<vmem>>, vector<8x32xbf16>
    %cst_30 = arith.constant dense<0.000000e+00> : vector<8x32xf32>
    %86 = tpu.matmul %84, %85, %cst_30 {dimension_numbers = #tpu.dot_dimension_numbers<[1], [0], [0], [1], [0, 0, 1, 1], [], []>} : vector<8x8xbf16>, vector<8x32xbf16>, vector<8x32xf32> -> vector<8x32xf32>
    %87 = arith.addf %66, %86 : vector<8x32xf32>
    %88 = vector.extract_strided_slice %36 {offsets = [0, 0, 16], sizes = [1, 8, 8], strides = [1, 1, 1]} : vector<1x8x32xbf16> to vector<1x8x8xbf16>
    %89 = vector.extract_strided_slice %39 {offsets = [0, 0, 16], sizes = [1, 8, 8], strides = [1, 1, 1]} : vector<1x8x32xbf16> to vector<1x8x8xbf16>
    %90 = vector.extract_strided_slice %42 {offsets = [0, 0, 16], sizes = [1, 8, 8], strides = [1, 1, 1]} : vector<1x8x32xbf16> to vector<1x8x8xbf16>
    "tpu.trace_start"() <{level = 10 : i32, message = "bqd,bkd->bqk"}> : () -> ()
    %cst_31 = arith.constant dense<0.000000e+00> : vector<1x8x8xf32>
    %91 = tpu.matmul %88, %89, %cst_31 {dimension_numbers = #tpu.dot_dimension_numbers<[2], [2], [1], [1], [0, 0, 0, 1, 1, 1], [0], [0]>} : vector<1x8x8xbf16>, vector<1x8x8xbf16>, vector<1x8x8xf32> -> vector<1x8x8xf32>
    "tpu.trace_stop"() : () -> ()
    %cst_32 = arith.constant dense<0xFF800000> : vector<1x8xf32>
    %92 = vector.multi_reduction <maximumf>, %91, %cst_32 [2] : vector<1x8x8xf32> to vector<1x8xf32>
    %93 = vector.shape_cast %92 : vector<1x8xf32> to vector<1x8x1xf32>
    %94 = vector.broadcast %93 : vector<1x8x1xf32> to vector<1x8x8xf32>
    %95 = arith.subf %91, %94 : vector<1x8x8xf32>
    %96 = math.exp %95 : vector<1x8x8xf32>
    %cst_33 = arith.constant dense<0.000000e+00> : vector<1x8xf32>
    %97 = vector.multi_reduction <add>, %96, %cst_33 [2] : vector<1x8x8xf32> to vector<1x8xf32>
    %98 = vector.shape_cast %97 : vector<1x8xf32> to vector<1x8x1xf32>
    %99 = tpu.reciprocal %98 {approx = true} : vector<1x8x1xf32> -> vector<1x8x1xf32>
    %100 = vector.broadcast %99 : vector<1x8x1xf32> to vector<1x8x8xf32>
    %101 = arith.mulf %96, %100 : vector<1x8x8xf32>
    %102 = arith.truncf %101 : vector<1x8x8xf32> to vector<1x8x8xbf16>
    "tpu.trace_start"() <{level = 10 : i32, message = "bqk,bkd->bqd"}> : () -> ()
    %cst_34 = arith.constant dense<0.000000e+00> : vector<1x8x8xf32>
    %103 = tpu.matmul %102, %90, %cst_34 {dimension_numbers = #tpu.dot_dimension_numbers<[2], [1], [1], [2], [0, 0, 0, 1, 1, 2], [0], [0]>} : vector<1x8x8xbf16>, vector<1x8x8xbf16>, vector<1x8x8xf32> -> vector<1x8x8xf32>
    "tpu.trace_stop"() : () -> ()
    %104 = vector.shape_cast %103 : vector<1x8x8xf32> to vector<8x8xf32>
    %105 = arith.truncf %104 : vector<8x8xf32> to vector<8x8xbf16>
    %c16 = arith.constant 16 : index
    %c0_35 = arith.constant 0 : index
    %106 = vector.load %arg6[%c16, %c0_35] : memref<32x32xbf16, #tpu.memory_space<vmem>>, vector<8x32xbf16>
    %cst_36 = arith.constant dense<0.000000e+00> : vector<8x32xf32>
    %107 = tpu.matmul %105, %106, %cst_36 {dimension_numbers = #tpu.dot_dimension_numbers<[1], [0], [0], [1], [0, 0, 1, 1], [], []>} : vector<8x8xbf16>, vector<8x32xbf16>, vector<8x32xf32> -> vector<8x32xf32>
    %108 = arith.addf %87, %107 : vector<8x32xf32>
    %109 = vector.extract_strided_slice %36 {offsets = [0, 0, 24], sizes = [1, 8, 8], strides = [1, 1, 1]} : vector<1x8x32xbf16> to vector<1x8x8xbf16>
    %110 = vector.extract_strided_slice %39 {offsets = [0, 0, 24], sizes = [1, 8, 8], strides = [1, 1, 1]} : vector<1x8x32xbf16> to vector<1x8x8xbf16>
    %111 = vector.extract_strided_slice %42 {offsets = [0, 0, 24], sizes = [1, 8, 8], strides = [1, 1, 1]} : vector<1x8x32xbf16> to vector<1x8x8xbf16>
    "tpu.trace_start"() <{level = 10 : i32, message = "bqd,bkd->bqk"}> : () -> ()
    %cst_37 = arith.constant dense<0.000000e+00> : vector<1x8x8xf32>
    %112 = tpu.matmul %109, %110, %cst_37 {dimension_numbers = #tpu.dot_dimension_numbers<[2], [2], [1], [1], [0, 0, 0, 1, 1, 1], [0], [0]>} : vector<1x8x8xbf16>, vector<1x8x8xbf16>, vector<1x8x8xf32> -> vector<1x8x8xf32>
    "tpu.trace_stop"() : () -> ()
    %cst_38 = arith.constant dense<0xFF800000> : vector<1x8xf32>
    %113 = vector.multi_reduction <maximumf>, %112, %cst_38 [2] : vector<1x8x8xf32> to vector<1x8xf32>
    %114 = vector.shape_cast %113 : vector<1x8xf32> to vector<1x8x1xf32>
    %115 = vector.broadcast %114 : vector<1x8x1xf32> to vector<1x8x8xf32>
    %116 = arith.subf %112, %115 : vector<1x8x8xf32>
    %117 = math.exp %116 : vector<1x8x8xf32>
    %cst_39 = arith.constant dense<0.000000e+00> : vector<1x8xf32>
    %118 = vector.multi_reduction <add>, %117, %cst_39 [2] : vector<1x8x8xf32> to vector<1x8xf32>
    %119 = vector.shape_cast %118 : vector<1x8xf32> to vector<1x8x1xf32>
    %120 = tpu.reciprocal %119 {approx = true} : vector<1x8x1xf32> -> vector<1x8x1xf32>
    %121 = vector.broadcast %120 : vector<1x8x1xf32> to vector<1x8x8xf32>
    %122 = arith.mulf %117, %121 : vector<1x8x8xf32>
    %123 = arith.truncf %122 : vector<1x8x8xf32> to vector<1x8x8xbf16>
    "tpu.trace_start"() <{level = 10 : i32, message = "bqk,bkd->bqd"}> : () -> ()
    %cst_40 = arith.constant dense<0.000000e+00> : vector<1x8x8xf32>
    %124 = tpu.matmul %123, %111, %cst_40 {dimension_numbers = #tpu.dot_dimension_numbers<[2], [1], [1], [2], [0, 0, 0, 1, 1, 2], [0], [0]>} : vector<1x8x8xbf16>, vector<1x8x8xbf16>, vector<1x8x8xf32> -> vector<1x8x8xf32>
    "tpu.trace_stop"() : () -> ()
    %125 = vector.shape_cast %124 : vector<1x8x8xf32> to vector<8x8xf32>
    %126 = arith.truncf %125 : vector<8x8xf32> to vector<8x8xbf16>
    %c24 = arith.constant 24 : index
    %c0_41 = arith.constant 0 : index
    %127 = vector.load %arg6[%c24, %c0_41] : memref<32x32xbf16, #tpu.memory_space<vmem>>, vector<8x32xbf16>
    %cst_42 = arith.constant dense<0.000000e+00> : vector<8x32xf32>
    %128 = tpu.matmul %126, %127, %cst_42 {dimension_numbers = #tpu.dot_dimension_numbers<[1], [0], [0], [1], [0, 0, 1, 1], [], []>} : vector<8x8xbf16>, vector<8x32xbf16>, vector<8x32xf32> -> vector<8x32xf32>
    %129 = arith.addf %108, %128 : vector<8x32xf32>
    %cst_43 = arith.constant dense<0.000000e+00> : vector<8xf32>
    %130 = vector.multi_reduction <add>, %129, %cst_43 [1] : vector<8x32xf32> to vector<8xf32>
    %131 = vector.shape_cast %130 : vector<8xf32> to vector<8x1xf32>
    %cst_44 = arith.constant 3.200000e+01 : f32
    %132 = vector.broadcast %cst_44 : f32 to vector<8x1xf32>
    %133 = arith.divf %131, %132 : vector<8x1xf32>
    %134 = vector.broadcast %133 : vector<8x1xf32> to vector<8x32xf32>
    %135 = arith.subf %129, %134 : vector<8x32xf32>
    %136 = arith.mulf %135, %135 : vector<8x32xf32>
    %cst_45 = arith.constant dense<0.000000e+00> : vector<8xf32>
    %137 = vector.multi_reduction <add>, %136, %cst_45 [1] : vector<8x32xf32> to vector<8xf32>
    %138 = vector.shape_cast %137 : vector<8xf32> to vector<8x1xf32>
    %cst_46 = arith.constant 3.200000e+01 : f32
    %139 = vector.broadcast %cst_46 : f32 to vector<8x1xf32>
    %140 = arith.divf %138, %139 : vector<8x1xf32>
    %141 = vector.broadcast %133 : vector<8x1xf32> to vector<8x32xf32>
    %142 = arith.subf %129, %141 : vector<8x32xf32>
    %cst_47 = arith.constant 9.99999974E-6 : f32
    %143 = vector.broadcast %cst_47 : f32 to vector<8x1xf32>
    %144 = arith.addf %140, %143 : vector<8x1xf32>
    %145 = math.rsqrt %144 : vector<8x1xf32>
    %146 = vector.broadcast %145 : vector<8x1xf32> to vector<8x32xf32>
    %147 = arith.mulf %142, %146 : vector<8x32xf32>
    %c0_48 = arith.constant 0 : index
    %c0_49 = arith.constant 0 : index
    %148 = vector.load %arg8[%c0_48, %c0_49] : memref<1x32xf32, #tpu.memory_space<vmem>>, vector<1x32xf32>
    %149 = vector.broadcast %148 : vector<1x32xf32> to vector<8x32xf32>
    %150 = arith.mulf %147, %149 : vector<8x32xf32>
    %c0_50 = arith.constant 0 : index
    %c0_51 = arith.constant 0 : index
    %151 = vector.load %arg9[%c0_50, %c0_51] : memref<1x32xf32, #tpu.memory_space<vmem>>, vector<1x32xf32>
    %152 = vector.broadcast %151 : vector<1x32xf32> to vector<8x32xf32>
    %153 = arith.addf %150, %152 : vector<8x32xf32>
    %154 = arith.truncf %153 : vector<8x32xf32> to vector<8x32xbf16>
    %c0_52 = arith.constant 0 : index
    %c0_53 = arith.constant 0 : index
    %155 = vector.load %arg10[%c0_52, %c0_53] : memref<32x128xbf16, #tpu.memory_space<vmem>>, vector<32x128xbf16>
    %cst_54 = arith.constant dense<0.000000e+00> : vector<8x128xf32>
    %156 = tpu.matmul %154, %155, %cst_54 {dimension_numbers = #tpu.dot_dimension_numbers<[1], [0], [0], [1], [0, 0, 1, 1], [], []>} : vector<8x32xbf16>, vector<32x128xbf16>, vector<8x128xf32> -> vector<8x128xf32>
    %c0_55 = arith.constant 0 : index
    %c0_56 = arith.constant 0 : index
    %157 = vector.load %arg11[%c0_55, %c0_56] : memref<1x128xf32, #tpu.memory_space<vmem>>, vector<1x128xf32>
    %158 = vector.broadcast %157 : vector<1x128xf32> to vector<8x128xf32>
    %159 = arith.addf %156, %158 : vector<8x128xf32>
    %160 = arith.mulf %159, %159 : vector<8x128xf32>
    %161 = arith.mulf %159, %160 : vector<8x128xf32>
    %cst_57 = arith.constant 4.471500e-02 : f32
    %162 = vector.broadcast %cst_57 : f32 to vector<8x128xf32>
    %163 = arith.mulf %162, %161 : vector<8x128xf32>
    %164 = arith.addf %159, %163 : vector<8x128xf32>
    %cst_58 = arith.constant 0.797884583 : f32
    %165 = vector.broadcast %cst_58 : f32 to vector<8x128xf32>
    %166 = arith.mulf %165, %164 : vector<8x128xf32>
    %167 = math.tanh %166 : vector<8x128xf32>
    %cst_59 = arith.constant 1.000000e+00 : f32
    %168 = vector.broadcast %cst_59 : f32 to vector<8x128xf32>
    %169 = arith.addf %168, %167 : vector<8x128xf32>
    %cst_60 = arith.constant 5.000000e-01 : f32
    %170 = vector.broadcast %cst_60 : f32 to vector<8x128xf32>
    %171 = arith.mulf %170, %169 : vector<8x128xf32>
    %172 = arith.mulf %159, %171 : vector<8x128xf32>
    %173 = arith.truncf %172 : vector<8x128xf32> to vector<8x128xbf16>
    %c0_61 = arith.constant 0 : index
    %c0_62 = arith.constant 0 : index
    %174 = vector.load %arg12[%c0_61, %c0_62] : memref<128x32xbf16, #tpu.memory_space<vmem>>, vector<128x32xbf16>
    %cst_63 = arith.constant dense<0.000000e+00> : vector<8x32xf32>
    %175 = tpu.matmul %173, %174, %cst_63 {dimension_numbers = #tpu.dot_dimension_numbers<[1], [0], [0], [1], [0, 0, 1, 1], [], []>} : vector<8x128xbf16>, vector<128x32xbf16>, vector<8x32xf32> -> vector<8x32xf32>
    %c0_64 = arith.constant 0 : index
    %c0_65 = arith.constant 0 : index
    %176 = vector.load %arg13[%c0_64, %c0_65] : memref<1x32xf32, #tpu.memory_space<vmem>>, vector<1x32xf32>
    %177 = vector.broadcast %176 : vector<1x32xf32> to vector<8x32xf32>
    %178 = arith.addf %175, %177 : vector<8x32xf32>
    %179 = arith.addf %129, %178 : vector<8x32xf32>
    %180 = vector.shape_cast %179 : vector<8x32xf32> to vector<1x8x32xf32>
    %c0_66 = arith.constant 0 : index
    %c0_67 = arith.constant 0 : index
    %c0_68 = arith.constant 0 : index
    %181 = vector.load %arg14[%c0_66, %c0_67, %c0_68] : memref<1x8x32xf32, #tpu.memory_space<vmem>>, vector<1x8x32xf32>
    tpu.vector_store %arg14[%c0_66, %c0_67, %c0_68], %180 {strides = array<i32>} : memref<1x8x32xf32, #tpu.memory_space<vmem>>, vector<1x8x32xf32>,
    return
  }
  func.func @transform_0(%arg0: i32) -> (i32, i32, i32) {
    %c0_i32 = arith.constant 0 : i32
    %c0_i32_0 = arith.constant 0 : i32
    %c0_i32_1 = arith.constant 0 : i32
    return %arg0, %c0_i32, %c0_i32_0 : i32, i32, i32
  }
  func.func @transform_1(%arg0: i32) -> (i32, i32) {
    %c0_i32 = arith.constant 0 : i32
    %c0_i32_0 = arith.constant 0 : i32
    %c0_i32_1 = arith.constant 0 : i32
    return %c0_i32, %c0_i32_0 : i32, i32
  }
  func.func @transform_2(%arg0: i32) -> (i32, i32) {
    %c0_i32 = arith.constant 0 : i32
    %c0_i32_0 = arith.constant 0 : i32
    %c0_i32_1 = arith.constant 0 : i32
    return %c0_i32, %c0_i32_0 : i32, i32
  }
  func.func @transform_3(%arg0: i32) -> (i32, i32) {
    %c0_i32 = arith.constant 0 : i32
    %c0_i32_0 = arith.constant 0 : i32
    %c0_i32_1 = arith.constant 0 : i32
    return %c0_i32, %c0_i32_0 : i32, i32
  }
  func.func @transform_4(%arg0: i32) -> (i32, i32) {
    %c0_i32 = arith.constant 0 : i32
    %c0_i32_0 = arith.constant 0 : i32
    %c0_i32_1 = arith.constant 0 : i32
    return %c0_i32, %c0_i32_0 : i32, i32
  }
  func.func @transform_5(%arg0: i32) -> (i32, i32) {
    %c0_i32 = arith.constant 0 : i32
    %c0_i32_0 = arith.constant 0 : i32
    %c0_i32_1 = arith.constant 0 : i32
    return %c0_i32, %c0_i32_0 : i32, i32
  }
  func.func @transform_6(%arg0: i32) -> (i32, i32) {
    %c0_i32 = arith.constant 0 : i32
    %c0_i32_0 = arith.constant 0 : i32
    %c0_i32_1 = arith.constant 0 : i32
    return %c0_i32, %c0_i32_0 : i32, i32
  }
  func.func @transform_7(%arg0: i32) -> (i32, i32) {
    %c0_i32 = arith.constant 0 : i32
    %c0_i32_0 = arith.constant 0 : i32
    %c0_i32_1 = arith.constant 0 : i32
    return %c0_i32, %c0_i32_0 : i32, i32
  }
  func.func @transform_8(%arg0: i32) -> (i32, i32) {
    %c0_i32 = arith.constant 0 : i32
    %c0_i32_0 = arith.constant 0 : i32
    %c0_i32_1 = arith.constant 0 : i32
    return %c0_i32, %c0_i32_0 : i32, i32
  }
  func.func @transform_9(%arg0: i32) -> (i32, i32) {
    %c0_i32 = arith.constant 0 : i32
    %c0_i32_0 = arith.constant 0 : i32
    %c0_i32_1 = arith.constant 0 : i32
    return %c0_i32, %c0_i32_0 : i32, i32
  }
  func.func @transform_10(%arg0: i32) -> (i32, i32) {
    %c0_i32 = arith.constant 0 : i32
    %c0_i32_0 = arith.constant 0 : i32
    %c0_i32_1 = arith.constant 0 : i32
    return %c0_i32, %c0_i32_0 : i32, i32
  }
  func.func @transform_11(%arg0: i32) -> (i32, i32) {
    %c0_i32 = arith.constant 0 : i32
    %c0_i32_0 = arith.constant 0 : i32
    %c0_i32_1 = arith.constant 0 : i32
    return %c0_i32, %c0_i32_0 : i32, i32
  }
  func.func @transform_12(%arg0: i32) -> (i32, i32) {
    %c0_i32 = arith.constant 0 : i32
    %c0_i32_0 = arith.constant 0 : i32
    %c0_i32_1 = arith.constant 0 : i32
    return %c0_i32, %c0_i32_0 : i32, i32
  }
  func.func @transform_13(%arg0: i32) -> (i32, i32, i32) {
    %c0_i32 = arith.constant 0 : i32
    %c0_i32_0 = arith.constant 0 : i32
    %c0_i32_1 = arith.constant 0 : i32
    return %arg0, %c0_i32, %c0_i32_0 : i32, i32, i32
  }
}

module attributes {stable_mosaic.version = 11 : i64} {
  func.func @_encoder_layer_kernel(%arg0: i32, %arg1: memref<1x8x32xf32, #tpu.memory_space<vmem>>, %arg2: memref<1x32xf32, #tpu.memory_space<vmem>>, %arg3: memref<1x32xf32, #tpu.memory_space<vmem>>, %arg4: memref<32x96xbf16, #tpu.memory_space<vmem>>, %arg5: memref<1x96xf32, #tpu.memory_space<vmem>>, %arg6: memref<32x32xbf16, #tpu.memory_space<vmem>>, %arg7: memref<1x32xf32, #tpu.memory_space<vmem>>, %arg8: memref<1x32xf32, #tpu.memory_space<vmem>>, %arg9: memref<1x32xf32, #tpu.memory_space<vmem>>, %arg10: memref<32x128xbf16, #tpu.memory_space<vmem>>, %arg11: memref<1x128xf32, #tpu.memory_space<vmem>>, %arg12: memref<128x32xbf16, #tpu.memory_space<vmem>>, %arg13: memref<1x32xf32, #tpu.memory_space<vmem>>, %arg14: memref<1x8x32xf32, #tpu.memory_space<vmem>>) attributes {dimension_semantics = [#tpu.dimension_semantics<parallel>], iteration_bounds = array<i64: 2>, scalar_prefetch = 0 : i64, scratch_operands = 0 : i64, tpu.core_type = #tpu.core_type<tc>, window_params = [{transform_indices = @transform_0, window_bounds = array<i64: 1, 8, 32>}, {pipeline_mode = #tpu.pipeline_mode<synchronous>, transform_indices = @transform_1, window_bounds = array<i64: 1, 32>}, {pipeline_mode = #tpu.pipeline_mode<synchronous>, transform_indices = @transform_2, window_bounds = array<i64: 1, 32>}, {pipeline_mode = #tpu.pipeline_mode<synchronous>, transform_indices = @transform_3, window_bounds = array<i64: 32, 96>}, {pipeline_mode = #tpu.pipeline_mode<synchronous>, transform_indices = @transform_4, window_bounds = array<i64: 1, 96>}, {pipeline_mode = #tpu.pipeline_mode<synchronous>, transform_indices = @transform_5, window_bounds = array<i64: 32, 32>}, {pipeline_mode = #tpu.pipeline_mode<synchronous>, transform_indices = @transform_6, window_bounds = array<i64: 1, 32>}, {pipeline_mode = #tpu.pipeline_mode<synchronous>, transform_indices = @transform_7, window_bounds = array<i64: 1, 32>}, {pipeline_mode = #tpu.pipeline_mode<synchronous>, transform_indices = @transform_8, window_bounds = array<i64: 1, 32>}, {pipeline_mode = #tpu.pipeline_mode<synchronous>, transform_indices = @transform_9, window_bounds = array<i64: 32, 128>}, {pipeline_mode = #tpu.pipeline_mode<synchronous>, transform_indices = @transform_10, window_bounds = array<i64: 1, 128>}, {pipeline_mode = #tpu.pipeline_mode<synchronous>, transform_indices = @transform_11, window_bounds = array<i64: 128, 32>}, {pipeline_mode = #tpu.pipeline_mode<synchronous>, transform_indices = @transform_12, window_bounds = array<i64: 1, 32>}, {transform_indices = @transform_13, window_bounds = array<i64: 1, 8, 32>}]} {
    %c0 = arith.constant 0 : index
    %c0_0 = arith.constant 0 : index
    %c0_1 = arith.constant 0 : index
    %0 = vector.load %arg1[%c0, %c0_0, %c0_1] : memref<1x8x32xf32, #tpu.memory_space<vmem>>, vector<1x8x32xf32>
    %1 = vector.shape_cast %0 : vector<1x8x32xf32> to vector<8x32xf32>
    %cst = arith.constant dense<0.000000e+00> : vector<8xf32>
    %2 = vector.multi_reduction <add>, %1, %cst [1] : vector<8x32xf32> to vector<8xf32>
    %3 = vector.shape_cast %2 : vector<8xf32> to vector<8x1xf32>
    %cst_2 = arith.constant 3.200000e+01 : f32
    %4 = vector.broadcast %cst_2 : f32 to vector<8x1xf32>
    %5 = arith.divf %3, %4 : vector<8x1xf32>
    %6 = vector.broadcast %5 : vector<8x1xf32> to vector<8x32xf32>
    %7 = arith.subf %1, %6 : vector<8x32xf32>
    %8 = arith.mulf %7, %7 : vector<8x32xf32>
    %cst_3 = arith.constant dense<0.000000e+00> : vector<8xf32>
    %9 = vector.multi_reduction <add>, %8, %cst_3 [1] : vector<8x32xf32> to vector<8xf32>
    %10 = vector.shape_cast %9 : vector<8xf32> to vector<8x1xf32>
    %cst_4 = arith.constant 3.200000e+01 : f32
    %11 = vector.broadcast %cst_4 : f32 to vector<8x1xf32>
    %12 = arith.divf %10, %11 : vector<8x1xf32>
    %13 = vector.broadcast %5 : vector<8x1xf32> to vector<8x32xf32>
    %14 = arith.subf %1, %13 : vector<8x32xf32>
    %cst_5 = arith.constant 9.99999974E-6 : f32
    %15 = vector.broadcast %cst_5 : f32 to vector<8x1xf32>
    %16 = arith.addf %12, %15 : vector<8x1xf32>
    %17 = math.rsqrt %16 : vector<8x1xf32>
    %18 = vector.broadcast %17 : vector<8x1xf32> to vector<8x32xf32>
    %19 = arith.mulf %14, %18 : vector<8x32xf32>
    %c0_6 = arith.constant 0 : index
    %c0_7 = arith.constant 0 : index
    %20 = vector.load %arg2[%c0_6, %c0_7] : memref<1x32xf32, #tpu.memory_space<vmem>>, vector<1x32xf32>
    %21 = vector.broadcast %20 : vector<1x32xf32> to vector<8x32xf32>
    %22 = arith.mulf %19, %21 : vector<8x32xf32>
    %c0_8 = arith.constant 0 : index
    %c0_9 = arith.constant 0 : index
    %23 = vector.load %arg3[%c0_8, %c0_9] : memref<1x32xf32, #tpu.memory_space<vmem>>, vector<1x32xf32>
    %24 = vector.broadcast %23 : vector<1x32xf32> to vector<8x32xf32>
    %25 = arith.addf %22, %24 : vector<8x32xf32>
    %26 = arith.truncf %25 : vector<8x32xf32> to vector<8x32xbf16>
    %c0_10 = arith.constant 0 : index
    %c0_11 = arith.constant 0 : index
    %27 = vector.load %arg4[%c0_10, %c0_11] : memref<32x96xbf16, #tpu.memory_space<vmem>>, vector<32x96xbf16>
    %cst_12 = arith.constant dense<0.000000e+00> : vector<8x96xf32>
    %28 = tpu.matmul %26, %27, %cst_12 {dimension_numbers = #tpu.dot_dimension_numbers<[1], [0], [0], [1], [0, 0, 1, 1], [], []>} : vector<8x32xbf16>, vector<32x96xbf16>, vector<8x96xf32> -> vector<8x96xf32>
    %c0_13 = arith.constant 0 : index
    %c0_14 = arith.constant 0 : index
    %29 = vector.load %arg5[%c0_13, %c0_14] : memref<1x96xf32, #tpu.memory_space<vmem>>, vector<1x96xf32>
    %30 = vector.broadcast %29 : vector<1x96xf32> to vector<8x96xf32>
    %31 = arith.addf %28, %30 : vector<8x96xf32>
    %32 = vector.extract_strided_slice %31 {offsets = [0, 0], sizes = [8, 32], strides = [1, 1]} : vector<8x96xf32> to vector<8x32xf32>
    %cst_15 = arith.constant 0.353553385 : f32
    %33 = vector.broadcast %cst_15 : f32 to vector<8x32xf32>
    %34 = arith.mulf %32, %33 : vector<8x32xf32>
    %35 = arith.truncf %34 : vector<8x32xf32> to vector<8x32xbf16>
    %36 = vector.shape_cast %35 : vector<8x32xbf16> to vector<1x8x32xbf16>
    %37 = vector.extract_strided_slice %31 {offsets = [0, 32], sizes = [8, 32], strides = [1, 1]} : vector<8x96xf32> to vector<8x32xf32>
    %38 = arith.truncf %37 : vector<8x32xf32> to vector<8x32xbf16>
    %39 = vector.shape_cast %38 : vector<8x32xbf16> to vector<1x8x32xbf16>
    %40 = vector.extract_strided_slice %31 {offsets = [0, 64], sizes = [8, 32], strides = [1, 1]} : vector<8x96xf32> to vector<8x32xf32>
    %41 = arith.truncf %40 : vector<8x32xf32> to vector<8x32xbf16>
    %42 = vector.shape_cast %41 : vector<8x32xbf16> to vector<1x8x32xbf16>
    %c0_16 = arith.constant 0 : index
    %c0_17 = arith.constant 0 : index
    %43 = vector.load %arg7[%c0_16, %c0_17] : memref<1x32xf32, #tpu.memory_space<vmem>>, vector<1x32xf32>
    %44 = vector.broadcast %43 : vector<1x32xf32> to vector<8x32xf32>
    %45 = arith.addf %1, %44 : vector<8x32xf32>
    %46 = vector.extract_strided_slice %36 {offsets = [0, 0, 0], sizes = [1, 8, 8], strides = [1, 1, 1]} : vector<1x8x32xbf16> to vector<1x8x8xbf16>
    %47 = vector.extract_strided_slice %39 {offsets = [0, 0, 0], sizes = [1, 8, 8], strides = [1, 1, 1]} : vector<1x8x32xbf16> to vector<1x8x8xbf16>
    %48 = vector.extract_strided_slice %42 {offsets = [0, 0, 0], sizes = [1, 8, 8], strides = [1, 1, 1]} : vector<1x8x32xbf16> to vector<1x8x8xbf16>
    "tpu.trace_start"() <{level = 10 : i32, message = "bqd,bkd->bqk"}> : () -> ()
    %cst_18 = arith.constant dense<0.000000e+00> : vector<1x8x8xf32>
    %49 = tpu.matmul %46, %47, %cst_18 {dimension_numbers = #tpu.dot_dimension_numbers<[2], [2], [1], [1], [0, 0, 0, 1, 1, 1], [0], [0]>} : vector<1x8x8xbf16>, vector<1x8x8xbf16>, vector<1x8x8xf32> -> vector<1x8x8xf32>
    "tpu.trace_stop"() : () -> ()
    %cst_19 = arith.constant dense<0xFF800000> : vector<1x8xf32>
    %50 = vector.multi_reduction <maximumf>, %49, %cst_19 [2] : vector<1x8x8xf32> to vector<1x8xf32>
    %51 = vector.shape_cast %50 : vector<1x8xf32> to vector<1x8x1xf32>
    %52 = vector.broadcast %51 : vector<1x8x1xf32> to vector<1x8x8xf32>
    %53 = arith.subf %49, %52 : vector<1x8x8xf32>
    %54 = math.exp %53 : vector<1x8x8xf32>
    %cst_20 = arith.constant dense<0.000000e+00> : vector<1x8xf32>
    %55 = vector.multi_reduction <add>, %54, %cst_20 [2] : vector<1x8x8xf32> to vector<1x8xf32>
    %56 = vector.shape_cast %55 : vector<1x8xf32> to vector<1x8x1xf32>
    %57 = tpu.reciprocal %56 {approx = true} : vector<1x8x1xf32> -> vector<1x8x1xf32>
    %58 = vector.broadcast %57 : vector<1x8x1xf32> to vector<1x8x8xf32>
    %59 = arith.mulf %54, %58 : vector<1x8x8xf32>
    %60 = arith.truncf %59 : vector<1x8x8xf32> to vector<1x8x8xbf16>
    "tpu.trace_start"() <{level = 10 : i32, message = "bqk,bkd->bqd"}> : () -> ()
    %cst_21 = arith.constant dense<0.000000e+00> : vector<1x8x8xf32>
    %61 = tpu.matmul %60, %48, %cst_21 {dimension_numbers = #tpu.dot_dimension_numbers<[2], [1], [1], [2], [0, 0, 0, 1, 1, 2], [0], [0]>} : vector<1x8x8xbf16>, vector<1x8x8xbf16>, vector<1x8x8xf32> -> vector<1x8x8xf32>
    "tpu.trace_stop"() : () -> ()
    %62 = vector.shape_cast %61 : vector<1x8x8xf32> to vector<8x8xf32>
    %63 = arith.truncf %62 : vector<8x8xf32> to vector<8x8xbf16>
    %c0_22 = arith.constant 0 : index
    %c0_23 = arith.constant 0 : index
    %64 = vector.load %arg6[%c0_22, %c0_23] : memref<32x32xbf16, #tpu.memory_space<vmem>>, vector<8x32xbf16>
    %cst_24 = arith.constant dense<0.000000e+00> : vector<8x32xf32>
    %65 = tpu.matmul %63, %64, %cst_24 {dimension_numbers = #tpu.dot_dimension_numbers<[1], [0], [0], [1], [0, 0, 1, 1], [], []>} : vector<8x8xbf16>, vector<8x32xbf16>, vector<8x32xf32> -> vector<8x32xf32>
    %66 = arith.addf %45, %65 : vector<8x32xf32>
    %67 = vector.extract_strided_slice %36 {offsets = [0, 0, 8], sizes = [1, 8, 8], strides = [1, 1, 1]} : vector<1x8x32xbf16> to vector<1x8x8xbf16>
    %68 = vector.extract_strided_slice %39 {offsets = [0, 0, 8], sizes = [1, 8, 8], strides = [1, 1, 1]} : vector<1x8x32xbf16> to vector<1x8x8xbf16>
    %69 = vector.extract_strided_slice %42 {offsets = [0, 0, 8], sizes = [1, 8, 8], strides = [1, 1, 1]} : vector<1x8x32xbf16> to vector<1x8x8xbf16>
    "tpu.trace_start"() <{level = 10 : i32, message = "bqd,bkd->bqk"}> : () -> ()
    %cst_25 = arith.constant dense<0.000000e+00> : vector<1x8x8xf32>
    %70 = tpu.matmul %67, %68, %cst_25 {dimension_numbers = #tpu.dot_dimension_numbers<[2], [2], [1], [1], [0, 0, 0, 1, 1, 1], [0], [0]>} : vector<1x8x8xbf16>, vector<1x8x8xbf16>, vector<1x8x8xf32> -> vector<1x8x8xf32>
    "tpu.trace_stop"() : () -> ()
    %cst_26 = arith.constant dense<0xFF800000> : vector<1x8xf32>
    %71 = vector.multi_reduction <maximumf>, %70, %cst_26 [2] : vector<1x8x8xf32> to vector<1x8xf32>
    %72 = vector.shape_cast %71 : vector<1x8xf32> to vector<1x8x1xf32>
    %73 = vector.broadcast %72 : vector<1x8x1xf32> to vector<1x8x8xf32>
    %74 = arith.subf %70, %73 : vector<1x8x8xf32>
    %75 = math.exp %74 : vector<1x8x8xf32>
    %cst_27 = arith.constant dense<0.000000e+00> : vector<1x8xf32>
    %76 = vector.multi_reduction <add>, %75, %cst_27 [2] : vector<1x8x8xf32> to vector<1x8xf32>
    %77 = vector.shape_cast %76 : vector<1x8xf32> to vector<1x8x1xf32>
    %78 = tpu.reciprocal %77 {approx = true} : vector<1x8x1xf32> -> vector<1x8x1xf32>
    %79 = vector.broadcast %78 : vector<1x8x1xf32> to vector<1x8x8xf32>
    %80 = arith.mulf %75, %79 : vector<1x8x8xf32>
    %81 = arith.truncf %80 : vector<1x8x8xf32> to vector<1x8x8xbf16>
    "tpu.trace_start"() <{level = 10 : i32, message = "bqk,bkd->bqd"}> : () -> ()
    %cst_28 = arith.constant dense<0.000000e+00> : vector<1x8x8xf32>
    %82 = tpu.matmul %81, %69, %cst_28 {dimension_numbers = #tpu.dot_dimension_numbers<[2], [1], [1], [2], [0, 0, 0, 1, 1, 2], [0], [0]>} : vector<1x8x8xbf16>, vector<1x8x8xbf16>, vector<1x8x8xf32> -> vector<1x8x8xf32>
    "tpu.trace_stop"() : () -> ()
    %83 = vector.shape_cast %82 : vector<1x8x8xf32> to vector<8x8xf32>
    %84 = arith.truncf %83 : vector<8x8xf32> to vector<8x8xbf16>
    %c8 = arith.constant 8 : index
    %c0_29 = arith.constant 0 : index
    %85 = vector.load %arg6[%c8, %c0_29] : memref<32x32xbf16, #tpu.memory_space<vmem>>, vector<8x32xbf16>
    %cst_30 = arith.constant dense<0.000000e+00> : vector<8x32xf32>
    %86 = tpu.matmul %84, %85, %cst_30 {dimension_numbers = #tpu.dot_dimension_numbers<[1], [0], [0], [1], [0, 0, 1, 1], [], []>} : vector<8x8xbf16>, vector<8x32xbf16>, vector<8x32xf32> -> vector<8x32xf32>
    %87 = arith.addf %66, %86 : vector<8x32xf32>
    %88 = vector.extract_strided_slice %36 {offsets = [0, 0, 16], sizes = [1, 8, 8], strides = [1, 1, 1]} : vector<1x8x32xbf16> to vector<1x8x8xbf16>
    %89 = vector.extract_strided_slice %39 {offsets = [0, 0, 16], sizes = [1, 8, 8], strides = [1, 1, 1]} : vector<1x8x32xbf16> to vector<1x8x8xbf16>
    %90 = vector.extract_strided_slice %42 {offsets = [0, 0, 16], sizes = [1, 8, 8], strides = [1, 1, 1]} : vector<1x8x32xbf16> to vector<1x8x8xbf16>
    "tpu.trace_start"() <{level = 10 : i32, message = "bqd,bkd->bqk"}> : () -> ()
    %cst_31 = arith.constant dense<0.000000e+00> : vector<1x8x8xf32>
    %91 = tpu.matmul %88, %89, %cst_31 {dimension_numbers = #tpu.dot_dimension_numbers<[2], [2], [1], [1], [0, 0, 0, 1, 1, 1], [0], [0]>} : vector<1x8x8xbf16>, vector<1x8x8xbf16>, vector<1x8x8xf32> -> vector<1x8x8xf32>
    "tpu.trace_stop"() : () -> ()
    %cst_32 = arith.constant dense<0xFF800000> : vector<1x8xf32>
    %92 = vector.multi_reduction <maximumf>, %91, %cst_32 [2] : vector<1x8x8xf32> to vector<1x8xf32>
    %93 = vector.shape_cast %92 : vector<1x8xf32> to vector<1x8x1xf32>
    %94 = vector.broadcast %93 : vector<1x8x1xf32> to vector<1x8x8xf32>
    %95 = arith.subf %91, %94 : vector<1x8x8xf32>
    %96 = math.exp %95 : vector<1x8x8xf32>
    %cst_33 = arith.constant dense<0.000000e+00> : vector<1x8xf32>
    %97 = vector.multi_reduction <add>, %96, %cst_33 [2] : vector<1x8x8xf32> to vector<1x8xf32>
    %98 = vector.shape_cast %97 : vector<1x8xf32> to vector<1x8x1xf32>
    %99 = tpu.reciprocal %98 {approx = true} : vector<1x8x1xf32> -> vector<1x8x1xf32>
    %100 = vector.broadcast %99 : vector<1x8x1xf32> to vector<1x8x8xf32>
    %101 = arith.mulf %96, %100 : vector<1x8x8xf32>
    %102 = arith.truncf %101 : vector<1x8x8xf32> to vector<1x8x8xbf16>
    "tpu.trace_start"() <{level = 10 : i32, message = "bqk,bkd->bqd"}> : () -> ()
    %cst_34 = arith.constant dense<0.000000e+00> : vector<1x8x8xf32>
    %103 = tpu.matmul %102, %90, %cst_34 {dimension_numbers = #tpu.dot_dimension_numbers<[2], [1], [1], [2], [0, 0, 0, 1, 1, 2], [0], [0]>} : vector<1x8x8xbf16>, vector<1x8x8xbf16>, vector<1x8x8xf32> -> vector<1x8x8xf32>
    "tpu.trace_stop"() : () -> ()
    %104 = vector.shape_cast %103 : vector<1x8x8xf32> to vector<8x8xf32>
    %105 = arith.truncf %104 : vector<8x8xf32> to vector<8x8xbf16>
    %c16 = arith.constant 16 : index
    %c0_35 = arith.constant 0 : index
    %106 = vector.load %arg6[%c16, %c0_35] : memref<32x32xbf16, #tpu.memory_space<vmem>>, vector<8x32xbf16>
    %cst_36 = arith.constant dense<0.000000e+00> : vector<8x32xf32>
    %107 = tpu.matmul %105, %106, %cst_36 {dimension_numbers = #tpu.dot_dimension_numbers<[1], [0], [0], [1], [0, 0, 1, 1], [], []>} : vector<8x8xbf16>, vector<8x32xbf16>, vector<8x32xf32> -> vector<8x32xf32>
    %108 = arith.addf %87, %107 : vector<8x32xf32>
    %109 = vector.extract_strided_slice %36 {offsets = [0, 0, 24], sizes = [1, 8, 8], strides = [1, 1, 1]} : vector<1x8x32xbf16> to vector<1x8x8xbf16>
    %110 = vector.extract_strided_slice %39 {offsets = [0, 0, 24], sizes = [1, 8, 8], strides = [1, 1, 1]} : vector<1x8x32xbf16> to vector<1x8x8xbf16>
    %111 = vector.extract_strided_slice %42 {offsets = [0, 0, 24], sizes = [1, 8, 8], strides = [1, 1, 1]} : vector<1x8x32xbf16> to vector<1x8x8xbf16>
    "tpu.trace_start"() <{level = 10 : i32, message = "bqd,bkd->bqk"}> : () -> ()
    %cst_37 = arith.constant dense<0.000000e+00> : vector<1x8x8xf32>
    %112 = tpu.matmul %109, %110, %cst_37 {dimension_numbers = #tpu.dot_dimension_numbers<[2], [2], [1], [1], [0, 0, 0, 1, 1, 1], [0], [0]>} : vector<1x8x8xbf16>, vector<1x8x8xbf16>, vector<1x8x8xf32> -> vector<1x8x8xf32>
    "tpu.trace_stop"() : () -> ()
    %cst_38 = arith.constant dense<0xFF800000> : vector<1x8xf32>
    %113 = vector.multi_reduction <maximumf>, %112, %cst_38 [2] : vector<1x8x8xf32> to vector<1x8xf32>
    %114 = vector.shape_cast %113 : vector<1x8xf32> to vector<1x8x1xf32>
    %115 = vector.broadcast %114 : vector<1x8x1xf32> to vector<1x8x8xf32>
    %116 = arith.subf %112, %115 : vector<1x8x8xf32>
    %117 = math.exp %116 : vector<1x8x8xf32>
    %cst_39 = arith.constant dense<0.000000e+00> : vector<1x8xf32>
    %118 = vector.multi_reduction <add>, %117, %cst_39 [2] : vector<1x8x8xf32> to vector<1x8xf32>
    %119 = vector.shape_cast %118 : vector<1x8xf32> to vector<1x8x1xf32>
    %120 = tpu.reciprocal %119 {approx = true} : vector<1x8x1xf32> -> vector<1x8x1xf32>
    %121 = vector.broadcast %120 : vector<1x8x1xf32> to vector<1x8x8xf32>
    %122 = arith.mulf %117, %121 : vector<1x8x8xf32>
    %123 = arith.truncf %122 : vector<1x8x8xf32> to vector<1x8x8xbf16>
    "tpu.trace_start"() <{level = 10 : i32, message = "bqk,bkd->bqd"}> : () -> ()
    %cst_40 = arith.constant dense<0.000000e+00> : vector<1x8x8xf32>
    %124 = tpu.matmul %123, %111, %cst_40 {dimension_numbers = #tpu.dot_dimension_numbers<[2], [1], [1], [2], [0, 0, 0, 1, 1, 2], [0], [0]>} : vector<1x8x8xbf16>, vector<1x8x8xbf16>, vector<1x8x8xf32> -> vector<1x8x8xf32>
    "tpu.trace_stop"() : () -> ()
    %125 = vector.shape_cast %124 : vector<1x8x8xf32> to vector<8x8xf32>
    %126 = arith.truncf %125 : vector<8x8xf32> to vector<8x8xbf16>
    %c24 = arith.constant 24 : index
    %c0_41 = arith.constant 0 : index
    %127 = vector.load %arg6[%c24, %c0_41] : memref<32x32xbf16, #tpu.memory_space<vmem>>, vector<8x32xbf16>
    %cst_42 = arith.constant dense<0.000000e+00> : vector<8x32xf32>
    %128 = tpu.matmul %126, %127, %cst_42 {dimension_numbers = #tpu.dot_dimension_numbers<[1], [0], [0], [1], [0, 0, 1, 1], [], []>} : vector<8x8xbf16>, vector<8x32xbf16>, vector<8x32xf32> -> vector<8x32xf32>
    %129 = arith.addf %108, %128 : vector<8x32xf32>
    %cst_43 = arith.constant dense<0.000000e+00> : vector<8xf32>
    %130 = vector.multi_reduction <add>, %129, %cst_43 [1] : vector<8x32xf32> to vector<8xf32>
    %131 = vector.shape_cast %130 : vector<8xf32> to vector<8x1xf32>
    %cst_44 = arith.constant 3.200000e+01 : f32
    %132 = vector.broadcast %cst_44 : f32 to vector<8x1xf32>
    %133 = arith.divf %131, %132 : vector<8x1xf32>
    %134 = vector.broadcast %133 : vector<8x1xf32> to vector<8x32xf32>
    %135 = arith.subf %129, %134 : vector<8x32xf32>
    %136 = arith.mulf %135, %135 : vector<8x32xf32>
    %cst_45 = arith.constant dense<0.000000e+00> : vector<8xf32>
    %137 = vector.multi_reduction <add>, %136, %cst_45 [1] : vector<8x32xf32> to vector<8xf32>
    %138 = vector.shape_cast %137 : vector<8xf32> to vector<8x1xf32>
    %cst_46 = arith.constant 3.200000e+01 : f32
    %139 = vector.broadcast %cst_46 : f32 to vector<8x1xf32>
    %140 = arith.divf %138, %139 : vector<8x1xf32>
    %141 = vector.broadcast %133 : vector<8x1xf32> to vector<8x32xf32>
    %142 = arith.subf %129, %141 : vector<8x32xf32>
    %cst_47 = arith.constant 9.99999974E-6 : f32
    %143 = vector.broadcast %cst_47 : f32 to vector<8x1xf32>
    %144 = arith.addf %140, %143 : vector<8x1xf32>
    %145 = math.rsqrt %144 : vector<8x1xf32>
    %146 = vector.broadcast %145 : vector<8x1xf32> to vector<8x32xf32>
    %147 = arith.mulf %142, %146 : vector<8x32xf32>
    %c0_48 = arith.constant 0 : index
    %c0_49 = arith.constant 0 : index
    %148 = vector.load %arg8[%c0_48, %c0_49] : memref<1x32xf32, #tpu.memory_space<vmem>>, vector<1x32xf32>
    %149 = vector.broadcast %148 : vector<1x32xf32> to vector<8x32xf32>
    %150 = arith.mulf %147, %149 : vector<8x32xf32>
    %c0_50 = arith.constant 0 : index
    %c0_51 = arith.constant 0 : index
    %151 = vector.load %arg9[%c0_50, %c0_51] : memref<1x32xf32, #tpu.memory_space<vmem>>, vector<1x32xf32>
    %152 = vector.broadcast %151 : vector<1x32xf32> to vector<8x32xf32>
    %153 = arith.addf %150, %152 : vector<8x32xf32>
    %154 = arith.truncf %153 : vector<8x32xf32> to vector<8x32xbf16>
    %c0_52 = arith.constant 0 : index
    %c0_53 = arith.constant 0 : index
    %155 = vector.load %arg10[%c0_52, %c0_53] : memref<32x128xbf16, #tpu.memory_space<vmem>>, vector<32x128xbf16>
    %cst_54 = arith.constant dense<0.000000e+00> : vector<8x128xf32>
    %156 = tpu.matmul %154, %155, %cst_54 {dimension_numbers = #tpu.dot_dimension_numbers<[1], [0], [0], [1], [0, 0, 1, 1], [], []>} : vector<8x32xbf16>, vector<32x128xbf16>, vector<8x128xf32> -> vector<8x128xf32>
    %c0_55 = arith.constant 0 : index
    %c0_56 = arith.constant 0 : index
    %157 = vector.load %arg11[%c0_55, %c0_56] : memref<1x128xf32, #tpu.memory_space<vmem>>, vector<1x128xf32>
    %158 = vector.broadcast %157 : vector<1x128xf32> to vector<8x128xf32>
    %159 = arith.addf %156, %158 : vector<8x128xf32>
    %160 = arith.mulf %159, %159 : vector<8x128xf32>
    %161 = arith.mulf %159, %160 : vector<8x128xf32>
    %cst_57 = arith.constant 4.471500e-02 : f32
    %162 = vector.broadcast %cst_57 : f32 to vector<8x128xf32>
    %163 = arith.mulf %162, %161 : vector<8x128xf32>
    %164 = arith.addf %159, %163 : vector<8x128xf32>
    %cst_58 = arith.constant 0.797884583 : f32
    %165 = vector.broadcast %cst_58 : f32 to vector<8x128xf32>
    %166 = arith.mulf %165, %164 : vector<8x128xf32>
    %167 = math.tanh %166 : vector<8x128xf32>
    %cst_59 = arith.constant 1.000000e+00 : f32
    %168 = vector.broadcast %cst_59 : f32 to vector<8x128xf32>
    %169 = arith.addf %168, %167 : vector<8x128xf32>
    %cst_60 = arith.constant 5.000000e-01 : f32
    %170 = vector.broadcast %cst_60 : f32 to vector<8x128xf32>
    %171 = arith.mulf %170, %169 : vector<8x128xf32>
    %172 = arith.mulf %159, %171 : vector<8x128xf32>
    %173 = arith.truncf %172 : vector<8x128xf32> to vector<8x128xbf16>
    %c0_61 = arith.constant 0 : index
    %c0_62 = arith.constant 0 : index
    %174 = vector.load %arg12[%c0_61, %c0_62] : memref<128x32xbf16, #tpu.memory_space<vmem>>, vector<128x32xbf16>
    %cst_63 = arith.constant dense<0.000000e+00> : vector<8x32xf32>
    %175 = tpu.matmul %173, %174, %cst_63 {dimension_numbers = #tpu.dot_dimension_numbers<[1], [0], [0], [1], [0, 0, 1, 1], [], []>} : vector<8x128xbf16>, vector<128x32xbf16>, vector<8x32xf32> -> vector<8x32xf32>
    %c0_64 = arith.constant 0 : index
    %c0_65 = arith.constant 0 : index
    %176 = vector.load %arg13[%c0_64, %c0_65] : memref<1x32xf32, #tpu.memory_space<vmem>>, vector<1x32xf32>
    %177 = vector.broadcast %176 : vector<1x32xf32> to vector<8x32xf32>
    %178 = arith.addf %175, %177 : vector<8x32xf32>
    %179 = arith.addf %129, %178 : vector<8x32xf32>
    %180 = vector.shape_cast %179 : vector<8x32xf32> to vector<1x8x32xf32>
    %c0_66 = arith.constant 0 : index
    %c0_67 = arith.constant 0 : index
    %c0_68 = arith.constant 0 : index
    %181 = vector.load %arg14[%c0_66, %c0_67, %c0_68] : memref<1x8x32xf32, #tpu.memory_space<vmem>>, vector<1x8x32xf32>
    tpu.vector_store %arg14[%c0_66, %c0_67, %c0_68], %180 {strides = array<i32>} : memref<1x8x32xf32, #tpu.memory_space<vmem>>, vector<1x8x32xf32>,
    return
  }
  func.func @transform_0(%arg0: i32) -> (i32, i32, i32) {
    %c0_i32 = arith.constant 0 : i32
    %c0_i32_0 = arith.constant 0 : i32
    %c0_i32_1 = arith.constant 0 : i32
    return %arg0, %c0_i32, %c0_i32_0 : i32, i32, i32
  }
  func.func @transform_1(%arg0: i32) -> (i32, i32) {
    %c0_i32 = arith.constant 0 : i32
    %c0_i32_0 = arith.constant 0 : i32
    %c0_i32_1 = arith.constant 0 : i32
    return %c0_i32, %c0_i32_0 : i32, i32
  }
  func.func @transform_2(%arg0: i32) -> (i32, i32) {
    %c0_i32 = arith.constant 0 : i32
    %c0_i32_0 = arith.constant 0 : i32
    %c0_i32_1 = arith.constant 0 : i32
    return %c0_i32, %c0_i32_0 : i32, i32
  }
  func.func @transform_3(%arg0: i32) -> (i32, i32) {
    %c0_i32 = arith.constant 0 : i32
    %c0_i32_0 = arith.constant 0 : i32
    %c0_i32_1 = arith.constant 0 : i32
    return %c0_i32, %c0_i32_0 : i32, i32
  }
  func.func @transform_4(%arg0: i32) -> (i32, i32) {
    %c0_i32 = arith.constant 0 : i32
    %c0_i32_0 = arith.constant 0 : i32
    %c0_i32_1 = arith.constant 0 : i32
    return %c0_i32, %c0_i32_0 : i32, i32
  }
  func.func @transform_5(%arg0: i32) -> (i32, i32) {
    %c0_i32 = arith.constant 0 : i32
    %c0_i32_0 = arith.constant 0 : i32
    %c0_i32_1 = arith.constant 0 : i32
    return %c0_i32, %c0_i32_0 : i32, i32
  }
  func.func @transform_6(%arg0: i32) -> (i32, i32) {
    %c0_i32 = arith.constant 0 : i32
    %c0_i32_0 = arith.constant 0 : i32
    %c0_i32_1 = arith.constant 0 : i32
    return %c0_i32, %c0_i32_0 : i32, i32
  }
  func.func @transform_7(%arg0: i32) -> (i32, i32) {
    %c0_i32 = arith.constant 0 : i32
    %c0_i32_0 = arith.constant 0 : i32
    %c0_i32_1 = arith.constant 0 : i32
    return %c0_i32, %c0_i32_0 : i32, i32
  }
  func.func @transform_8(%arg0: i32) -> (i32, i32) {
    %c0_i32 = arith.constant 0 : i32
    %c0_i32_0 = arith.constant 0 : i32
    %c0_i32_1 = arith.constant 0 : i32
    return %c0_i32, %c0_i32_0 : i32, i32
  }
  func.func @transform_9(%arg0: i32) -> (i32, i32) {
    %c0_i32 = arith.constant 0 : i32
    %c0_i32_0 = arith.constant 0 : i32
    %c0_i32_1 = arith.constant 0 : i32
    return %c0_i32, %c0_i32_0 : i32, i32
  }
  func.func @transform_10(%arg0: i32) -> (i32, i32) {
    %c0_i32 = arith.constant 0 : i32
    %c0_i32_0 = arith.constant 0 : i32
    %c0_i32_1 = arith.constant 0 : i32
    return %c0_i32, %c0_i32_0 : i32, i32
  }
  func.func @transform_11(%arg0: i32) -> (i32, i32) {
    %c0_i32 = arith.constant 0 : i32
    %c0_i32_0 = arith.constant 0 : i32
    %c0_i32_1 = arith.constant 0 : i32
    return %c0_i32, %c0_i32_0 : i32, i32
  }
  func.func @transform_12(%arg0: i32) -> (i32, i32) {
    %c0_i32 = arith.constant 0 : i32
    %c0_i32_0 = arith.constant 0 : i32
    %c0_i32_1 = arith.constant 0 : i32
    return %c0_i32, %c0_i32_0 : i32, i32
  }
  func.func @transform_13(%arg0: i32) -> (i32, i32, i32) {
    %c0_i32 = arith.constant 0 : i32
    %c0_i32_0 = arith.constant 0 : i32
    %c0_i32_1 = arith.constant 0 : i32
    return %arg0, %c0_i32, %c0_i32_0 : i32, i32, i32
  }
}

</mosaic_0001>

<bundles_post_ra>
// kernel: tpu_custom_call.1
= control target key start
LH: loop header
LB: loop body
LE: loop exit
PB: predicated region body
PF: predicated region fallthrough
CT: control target
= control target key end

     0   :  { %s2210_s0 = inlined_call_operand.vmem [shape: f32[2,8,32], index: 0, kind: input, shape index: {}]   ;;  %s2211_s1 = inlined_call_operand.vmem [shape: f32[1,32], index: 1, kind: input, shape index: {}]   ;;  %s2212_s2 = inlined_call_operand.vmem [shape: f32[1,32], index: 2, kind: input, shape index: {}]   ;;  %s2213_s3 = inlined_call_operand.vmem [shape: bf16[32,96], index: 3, kind: input, shape index: {}]   ;;  %s2214_s4 = inlined_call_operand.vmem [shape: f32[1,96], index: 4, kind: input, shape index: {}]   ;;  %s2215_s5 = inlined_call_operand.vmem [shape: bf16[32,32], index: 5, kind: input, shape index: {}]   ;;  %s2216_s6 = inlined_call_operand.vmem [shape: f32[1,32], index: 6, kind: input, shape index: {}]   ;;  %s2217_s7 = inlined_call_operand.vmem [shape: f32[1,32], index: 7, kind: input, shape index: {}]   ;;  %s2218_s8 = inlined_call_operand.vmem [shape: f32[1,32], index: 8, kind: input, shape index: {}]   ;;  %s2219_s9 = inlined_call_operand.vmem [shape: bf16[32,128], index: 9, kind: input, shape index: {}]   ;;  %s2220_s10 = inlined_call_operand.vmem [shape: f32[1,128], index: 10, kind: input, shape index: {}]   ;;  %s2221_s11 = inlined_call_operand.vmem [shape: bf16[128,32], index: 11, kind: input, shape index: {}]   ;;  %s2222_s12 = inlined_call_operand.vmem [shape: f32[1,32], index: 12, kind: input, shape index: {}]   ;;  %s2223_s13 = inlined_call_operand.hbm [shape: f32[2,8,32], index: 13, kind: output, shape index: {}]  }
   0x1   :  { %2224 = sst [smem:[#allocation5_spill]] %s2210_s0 }
   0x2   :  { %2225 = sst [smem:[#allocation6_spill]] %s2211_s1 }
   0x3   :  { %2226 = sst [smem:[#allocation7_spill]] %s2212_s2 }
   0x4   :  { %18 = vsyncpa [#allocation3], 0 }
   0x5   :  { %20 = vsyncpa [#allocation3 + $0x1], 0  ;;  %s1915_s25 = smov 0   ;;  %s1917_s26 = smov 0  }
   0x6   :  { %s1919_s27 = smov 0   ;;  %s1921_s28 = smov 0  }
   0x7 LB: > { %s1936_s29 = sadd.s32 4294967295, %s1829_s28   ;;  %s1477_s30 = sadd.s32 4294967294, %s1829_s28   ;;  %s1829_s28 = sphi %s1921_s28, %s2235_s28   ;;  %s1825_s27 = sphi %s1919_s27, %s2234_s27   ;;  %s1821_s26 = sphi %s1917_s26, %s2233_s26   ;;  %s1817_s25 = sphi %s1915_s25, %s2232_s25  }
   0x8   : > { %s1940_s14 = sadd.s32 1, %s1829_s28   ;;  %s311_s15 = sadd.s32 1, %s1825_s27 }
   0x9   : > { %s308_s16 = ssub.s32 %s1829_s28, %s1940_s14  ;;  %p321_p0 = scmp.ne.s32.totalorder %s1825_s27, %s1821_s26 }
   0xa   : > { %p309_p1 = scmp.eq.s32.totalorder %s308_s16, 0  ;;  %p322_p2 = scmp.eq.s32.totalorder %s1936_s29, 1 }
   0xb   : > { %p327_p3 = scmp.ne.s32.totalorder %s1821_s26, %s1817_s25  ;;  %p328_p4 = scmp.eq.s32.totalorder %s1477_s30, 1 }
   0xc   : > { %s1951_s17 = scalar_select %p309_p1, %s1825_s27, %s311_s15  }
   0xd   : > { %p1953_p5 = por %p322_p2, %p321_p0  ;;  %p1957_p6 = por %p328_p4, %p327_p3 }
   0xe   : > { %p1480_p7 = scmp.ge.s32.totalorder %s1829_s28, 1  ;;  %p389_p8 = scmp.lt.s32.totalorder %s1829_s28, 3 }
  0x10   : > { %p390_p9 = pnand %p1480_p7, %p389_p8 }
  0x11   : > { %p432_p10 = scmp.lt.s32.totalorder (!%p390_p9), %s1936_s29, 1  ;;  %vm438_vm0 = vcmask (!%p390_p9), 261120   ;;  %s2229_s0 = sld [smem:[#allocation5_spill]] (!%p390_p9)  ;;  %v1733_v7 = vld [vmem:[%s2213_s3] sm:$0xff] (!%p390_p9)   ;;  %v1831_v8 = vmov (!%p390_p9), 0.0   ;;  %vm1832_vm1 = vmmov (!%p390_p9), 0  }
  0x12   : > { %393 = sbr.rel (%p390_p9) target bundleno = 2976 (0xba0), region = 72  ;;  %1560 = vmatprep.subr.bf16.mxu1 (!%p390_p9), %v1831_v8  ;;  %1564 = vmatprep.mubr.msk.bf16.mxu1 (!%p390_p9), %vm1832_vm1, %v1831_v8  ;;  %v1734_v9 = vld [vmem:[%s2213_s3 + $0x8] sm:$0xff] (!%p390_p9)   ;;  %s2230_s1 = sld [smem:[#allocation6_spill]] (!%p390_p9)  ;;  %v1485_v20 = vld [vmem:[%s2214_s4] ss:$0 sm:$0xff] (!%p390_p9)  ;;  %vm550_vm2 = vcmask (!%p390_p9), 64512  }
  0x13   : > { %1561 = vmatpush3.bf16.msra.mxu1 (!%p390_p9), %v1733_v7  ;;  %1586 = vmatprep.subr.bf16.mxu0 (!%p390_p9), %v1831_v8  ;;  %s2231_s2 = sld [smem:[#allocation7_spill]] (!%p390_p9)  ;;  %s1833_s16 = smov (!%p390_p9), 96   ;;  %vm614_vm3 = vcmask (!%p390_p9), 1043456  }
  0x14   : > { %1562 = vmatprep.subr.bf16.mxu1 (!%p390_p9), %v1831_v8  ;;  %1588 = vmatprep.mubr.msk.bf16.mxu0 (!%p390_p9), %vm1832_vm1, %v1831_v8  ;;  %s1836_s22 = smov (!%p390_p9), 80   ;;  %s1837_s23 = smov (!%p390_p9), 112  }
  0x15   : > { %s1839_s30 = smov (!%p390_p9), 72   ;;  %s1840_s15 = smov (!%p390_p9), 104  }
  0x17   : > { %1563 = vmatpush3.bf16.msra.mxu1 (!%p390_p9), %v1734_v9 }
  0x18   : > { %1568 = vmatprep.subr.bf16.mxu1 (!%p390_p9), %v1831_v8  ;;  %v1483_v14 = vld [vmem:[%s2230_s1] ss:$0 sm:$0xff] (!%p390_p9) }
  0x19   : > { %s433_s20 = scalar_select %p432_p10, %s1936_s29, 1  ;;  %v1484_v16 = vld [vmem:[%s2231_s2] ss:$0 sm:$0xff] }
  0x1b   : > { %s1482_s21 = sshll.u32 %s433_s20, 3  ;;  %s1834_s20 = smov 120  }
  0x1c   : > { %s435_s24 = scalar_lea.vmem %s2229_s0, %s1482_s21  ;;  %s1835_s21 = smov 88  }
  0x1d   : > { %v1968_v0 = vld [vmem:[%s435_s24] sm:$0xff]  ;;  %s1838_s24 = smov 64  }
  0x1e   : > { %v439_v1 = vsel %vm438_vm0, %v1968_v0, 0.0 }
  0x1f   : > { %440 = vadd.xlane.f32.xlu0 %v439_v1 }
  0xac   : > { %v441_v2 = vpop.xlane.xlu0 %440 }
  0xad   : > { %v443_v3 = vmul.f32 0.03125, %v441_v2 }
  0xaf   : > { %v444_v4 = vsub.f32 %v1968_v0, %v443_v3 }
  0xb1   : > { %v445_v5 = vmul.f32 %v444_v4, %v444_v4 }
  0xb3   : > { %v446_v6 = vsel %vm438_vm0, %v445_v5, 0.0 }
  0xb4   : > { %447 = vadd.xlane.f32.xlu0 %v446_v6 }
 0x141   : > { %v448_v10 = vpop.xlane.xlu0 %447 }
 0x142   : > { %v449_v11 = vmul.f32 0.03125, %v448_v10 }
 0x144   : > { %v450_v12 = vadd.f32 1e-05, %v449_v11 }
 0x146   : > { %1745 = vrsqrt.f32 %v450_v12 }
 0x150   : > { %v1746_v13 = vpop.eup %1745 }
 0x151   : > { %v452_v15 = vmul.f32 %v1746_v13, %v444_v4 }
 0x153   : > { %v460_v17 = vmul.f32 %v1483_v14, %v452_v15 }
 0x155   : > { %v468_v18 = vadd.f32 %v1484_v16, %v460_v17 }
 0x157   : > { %v469_v19 = vpack.c.bf16 %v468_v18, %v468_v18 }
 0x159   : > { %1565 = vmatmul.mubr.msk.bf16.vlgmr.msra.gmra.mrb[0].mxu1 %vm438_vm0, %v469_v19 }
 0x15a   : > { %1570 = vmatprep.mubr.msk.bf16.mxu1 %vm1832_vm1, %v1831_v8 }
 0x22c   : > { %v530_v21 = vpop.f32.mrb[0].mxu1 }
 0x22d   : > { %v531_v22 = vadd.f32 %v1485_v20, %v530_v21  ;;  %v1566_v23 = vpop.f32.mrb[1].mxu1  ;;  %v659_v20 = vld [vmem:[%s2215_s5] sm:$0xf] }
 0x22e   : > { %v533_v24 = vpop.f32.mrb[2].mxu1  ;;  %v664_v21 = vsel %vm614_vm3, %v659_v20, 0 }
 0x22f   : > { %v536_v25 = vmul.f32 0.35355338, %v531_v22  ;;  %v2000_v26 = vpack.c.bf16 %v531_v22, %v531_v22  ;;  %v1567_v27 = vpop.f32.mrb[3].mxu1 }
 0x231   : > { %v2002_v28 = vpack.c.bf16 %v536_v25, %v536_v25  ;;  %548 = vrot.lane.b32.xlu1 %v2000_v26, %s1833_s16  ;;  %s1841_s16 = smov 48  }
 0x233   : > { %708 = vrot.lane.b32.xlu0 %v2002_v28, %s1834_s20  ;;  %s1842_s20 = smov 56  }
 0x235   : > { %710 = vrot.lane.b32.xlu1 %v2000_v26, %s1835_s21 }
 0x239   : > { %869 = vrot.lane.b32.xlu1 %v2000_v26, %s1836_s22  ;;  %s1518_s22 = sshll.u32 %s1936_s29, 7 }
 0x23a   : > { %s2167_s1 = scalar_lea.hbm %s2223_s13, %s1518_s22 }
 0x23d   : > { %867 = vrot.lane.b32.xlu1 %v2002_v28, %s1837_s23 }
 0x2a3   : > { %v549_v29 = vpop.permute.xlu1 %548 }
 0x2a4   : > { %v555_v30 = vsel %vm550_vm2, %v549_v29, 0 }
 0x2a5   : > { %1569 = vmatpush3.bf16.xpose.msra.mxu1 %v555_v30  ;;  %v709_v34 = vpop.permute.xlu0 %708 }
 0x2a6   : > { %1574 = vmatprep.subr.bf16.mxu1 %v1831_v8 }
 0x2a7   : > { %v711_v31 = vpop.permute.xlu1 %710 }
 0x2a8   : > { %v716_v32 = vsel %vm550_vm2, %v711_v31, 0 }
 0x2a9   : > { %1587 = vmatpush3.bf16.xpose.msra.mxu0 %v716_v32 }
 0x2aa   : > { %1604 = vmatprep.subr.bf16.mxu0 %v1831_v8 }
 0x2ab   : > { %v870_v33 = vpop.permute.xlu1 %869 }
 0x2ac   : > { %1571 = vmatmul.mubr.msk.bf16.vlgmr.msra.gmra.mrb[4].mxu1 %vm550_vm2, %v2002_v28  ;;  %v875_v35 = vsel %vm550_vm2, %v870_v33, 0 }
 0x2ad   : > { %1576 = vmatprep.mubr.msk.bf16.mxu1 %vm1832_vm1, %v1831_v8 }
 0x2af   : > { %v868_v36 = vpop.permute.xlu1 %867 }
 0x2b0   : > { %1589 = vmatmul.mubr.msk.bf16.vlgmr.msra.gmra.mrb[0].mxu0 %vm550_vm2, %v709_v34 }
 0x2b1   : > { %1605 = vmatpush3.bf16.xpose.msra.mxu0 %v875_v35  ;;  %1606 = vmatprep.mubr.msk.bf16.mxu0 %vm1832_vm1, %v1831_v8 }
 0x2b2   : > { %1610 = vmatprep.subr.bf16.mxu0 %v1831_v8 }
 0x2b8   : > { %1607 = vmatmul.mubr.msk.bf16.vlgmr.msra.gmra.mrb[4].mxu0 %vm550_vm2, %v868_v36 }
 0x2b9   : > { %1612 = vmatprep.mubr.msk.bf16.mxu0 %vm1832_vm1, %v1831_v8 }
 0x37f   : > { %v591_v37 = vpop.f32.mrb[4].mxu1 }
 0x380   : > { %v1572_v38 = vpop.f32.mrb[5].mxu1  ;;  %v597_v39 = vsel %vm550_vm2, %v591_v37, -inf }
 0x381   : > { %598 = vmax.xlane.f32.xlu1 %v597_v39  ;;  %v594_v40 = vpop.f32.mrb[6].mxu1 }
 0x382   : > { %v1573_v41 = vpop.f32.mrb[7].mxu1 }
 0x383   : > { %v2026_v42 = vpop.f32.mrb[0].mxu0 }
 0x384   : > { %v1590_v43 = vpop.f32.mrb[1].mxu0  ;;  %v758_v61 = vsel %vm550_vm2, %v2026_v42, -inf }
 0x385   : > { %v755_v44 = vpop.f32.mrb[2].mxu0  ;;  %v819_v43 = vld [vmem:[%s2215_s5 + $0x4] sm:$0xf] }
 0x386   : > { %v1591_v45 = vpop.f32.mrb[3].mxu0  ;;  %v824_v44 = vsel %vm614_vm3, %v819_v43, 0 }
 0x38b   : > { %v911_v46 = vpop.f32.mrb[4].mxu0 }
 0x38c   : > { %v1608_v47 = vpop.f32.mrb[5].mxu0  ;;  %v917_v48 = vsel %vm550_vm2, %v911_v46, -inf }
 0x38d   : > { %918 = vmax.xlane.f32.xlu0 %v917_v48  ;;  %v914_v49 = vpop.f32.mrb[6].mxu0 }
 0x38e   : > { %v1609_v50 = vpop.f32.mrb[7].mxu0 }
 0x38f   : > { %v978_v50 = vld [vmem:[%s2215_s5 + $0x8] sm:$0xf] }
 0x40e   : > { %v599_v51 = vpop.xlane.xlu1 %598 }
 0x40f   : > { %v600_v52 = vsub.f32 %v591_v37, %v599_v51 }
 0x411   : > { %v601_v53 = vmul.f32 1.442695, %v600_v52 }
 0x413   : > { %1747 = vpow2.f32 %v601_v53 }
 0x41a   : > { %v919_v54 = vpop.xlane.xlu0 %918 }
 0x41b   : > { %v920_v55 = vsub.f32 %v911_v46, %v919_v54  ;;  %v983_v54 = vsel %vm614_vm3, %v978_v50, 0 }
 0x41d   : > { %v1748_v56 = vpop.eup %1747  ;;  %v921_v57 = vmul.f32 1.442695, %v920_v55 }
 0x41e   : > { %v603_v58 = vsel %vm550_vm2, %v1748_v56, 0.0 }
 0x41f   : > { %1749 = vpow2.f32 %v921_v57  ;;  %604 = vadd.xlane.f32.xlu1 %v603_v58 }
 0x429   : > { %v1750_v59 = vpop.eup %1749 }
 0x42a   : > { %v923_v60 = vsel %vm550_vm2, %v1750_v59, 0.0 }
 0x42b   : > { %924 = vadd.xlane.f32.xlu0 %v923_v60 }
 0x430   : > { %609 = vrot.lane.b32.xlu1 %v2000_v26, %s1838_s24 }
 0x434   : > { %1028 = vrot.lane.b32.xlu1 %v2000_v26, %s1839_s30  ;;  %s1843_s30 = smov 40  }
 0x438   : > { %1026 = vrot.lane.b32.xlu1 %v2002_v28, %s1840_s15  ;;  %s429_s15 = sand.u32 1, %s1821_s26  }
 0x439   : > { %s1405_s29 = scalar_lea.sflag [#allocation3], %s429_s15 }
 0x441   : > { %929 = vrot.lane.b32.xlu0 %v2000_v26, %s1841_s16  ;;  %s1481_s16 = sshll.u32 %s429_s15, 3 }
 0x442   : > { %s431_s23 = scalar_lea.vmem [#allocation2], %s1481_s16 }
 0x443   : > { %s1418_s24 = sshll.u32 %s431_s23, 4  ;;  %s2169_s24 = int_to_ptr.vmem [resolvable:$true] %s1418_s24 }
 0x444   : > { %s1767_s16 = scalar_lea.vmem %s2169_s24, 128 }
 0x445   : > { %p1768_p11 = scmp.ne.s32.totalorder %s2169_s24, %s1767_s16 }
 0x447   : > { %p1769_p12 = pnand %p1768_p11, %p1953_p5 }
 0x449   : > { %p1770_p13 = pneg %p1769_p12 }
 0x45c   : > { %759 = vmax.xlane.f32.xlu1 %v758_v61  ;;  %v1137_v61 = vld [vmem:[%s2215_s5 + $0xc] sm:$0xf] }
 0x46d   : > { %770 = vrot.lane.b32.xlu1 %v2000_v26, %s1842_s20  ;;  %s1844_s20 = smov [#allocation2]  }
 0x46e   : > { %s1771_s21 = sshll.u32 %s1844_s20, 4  ;;  %s1772_s21 = int_to_ptr.vmem [resolvable:$false] %s1771_s21 }
 0x46f   : > { %s1773_s2 = scalar_lea.vmem %s1772_s21, 256  ;;  %p1774_p0 = scmp.lt.s32.totalorder %s2169_s24, %s1772_s21 }
 0x470   : > { %p1775_p1 = scmp.lt.s32.totalorder %s1773_s2, %s1767_s16 }
 0x472   : > { %p1776_p2 = por %p1775_p1, %p1774_p0 }
 0x474   : > { %p1777_p3 = pnand %p1776_p2, %p1770_p13 }
 0x4ac   : > { %v605_v62 = vpop.xlane.xlu1 %604 }
 0x4ad   : > { %1751 = vrcp.f32 %v605_v62 }
 0x4b0   : > { %v610_v63 = vpop.permute.xlu1 %609 }
 0x4b1   : > { %v616_v1 = vsel %vm614_vm3, %v610_v63, 0 }
 0x4b2   : > { %1575 = vmatpush3.bf16.msra.mxu1 %v616_v1  ;;  %v1142_v1 = vsel %vm614_vm3, %v1137_v61, 0 }
 0x4b3   : > { %1580 = vmatprep.subr.bf16.mxu1 %v1831_v8 }
 0x4b4   : > { %v1029_v11 = vpop.permute.xlu1 %1028 }
 0x4b5   : > { %v1034_v13 = vsel %vm550_vm2, %v1029_v11, 0 }
 0x4b7   : > { %v1752_v2 = vpop.eup %1751 }
 0x4b8   : > { %v607_v3 = vmul.f32 %v1752_v2, %v1748_v56  ;;  %v925_v4 = vpop.xlane.xlu0 %924  ;;  %v1027_v14 = vpop.permute.xlu1 %1026 }
 0x4b9   : > { %1753 = vrcp.f32 %v925_v4 }
 0x4ba   : > { %v608_v5 = vpack.c.bf16 %v607_v3, %v607_v3 }
 0x4bc   : > { %v930_v6 = vpop.permute.xlu0 %929  ;;  %1577 = vmatmul.mubr.msk.bf16.vlgmr.msra.gmra.mrb[8].mxu1 %vm550_vm2, %v608_v5 }
 0x4bd   : > { %v935_v7 = vsel %vm614_vm3, %v930_v6, 0  ;;  %1582 = vmatprep.mubr.msk.bf16.mxu1 %vm1832_vm1, %v1831_v8  ;;  %1581 = vmatpush3.bf16.msra.mxu1 %v664_v21  ;;  %v1736_v21 = vld [vmem:[%s2219_s9 + $0x8] sm:$0xff]  }
 0x4be   : > { %1611 = vmatpush3.bf16.msra.mxu0 %v935_v7  ;;  %1592 = vmatprep.subr.bf16.mxu1 %v1831_v8  ;;  %v1489_v7 = vld [vmem:[%s2216_s6] ss:$0 sm:$0xff] }
 0x4bf   : > { %1622 = vmatprep.subr.bf16.mxu0 %v1831_v8 }
 0x4c3   : > { %v1754_v9 = vpop.eup %1753 }
 0x4c4   : > { %v927_v10 = vmul.f32 %v1754_v9, %v1750_v59  ;;  %v546_v9 = vadd.f32 %v1489_v7, %v1968_v0  ;;  %v1735_v0 = vld [vmem:[%s2219_s9] sm:$0xff]  }
 0x4c6   : > { %v928_v12 = vpack.c.bf16 %v927_v10, %v927_v10 }
 0x4c8   : > { %1613 = vmatmul.mubr.msk.bf16.vlgmr.msra.gmra.mrb[8].mxu0 %vm550_vm2, %v928_v12 }
 0x4c9   : > { %1623 = vmatpush3.bf16.xpose.msra.mxu0 %v1034_v13  ;;  %1624 = vmatprep.mubr.msk.bf16.mxu0 %vm1832_vm1, %v1831_v8 }
 0x4ca   : > { %1640 = vmatprep.subr.bf16.mxu0 %v1831_v8 }
 0x4d0   : > { %1625 = vmatmul.mubr.msk.bf16.vlgmr.msra.gmra.mrb[12].mxu0 %vm550_vm2, %v1027_v14 }
 0x4d1   : > { %1644 = vmatprep.mubr.msk.bf16.mxu0 %vm1832_vm1, %v1831_v8  ;;  %1641 = vmatpush3.bf16.msra.mxu0 %v1735_v0 }
 0x4d2   : > { %1642 = vmatprep.subr.bf16.mxu0 %v1831_v8 }
 0x4d5   : > { %1643 = vmatpush3.bf16.msra.mxu0 %v1736_v21 }
 0x4d6   : > { %1648 = vmatprep.subr.bf16.mxu0 %v1831_v8 }
 0x4e9   : > { %v760_v15 = vpop.xlane.xlu1 %759 }
 0x4ea   : > { %v761_v16 = vsub.f32 %v2026_v42, %v760_v15 }
 0x4ec   : > { %v762_v17 = vmul.f32 1.442695, %v761_v16 }
 0x4ed   : > { %v771_v23 = vpop.permute.xlu1 %770 }
 0x4ee   : > { %1755 = vpow2.f32 %v762_v17  ;;  %v776_v30 = vsel %vm614_vm3, %v771_v23, 0 }
 0x4f8   : > { %v1756_v18 = vpop.eup %1755 }
 0x4f9   : > { %v764_v19 = vsel %vm550_vm2, %v1756_v18, 0.0 }
 0x4fa   : > { %765 = vadd.xlane.f32.xlu0 %v764_v19 }
 0x587   : > { %v766_v22 = vpop.xlane.xlu0 %765 }
 0x588   : > { %1757 = vrcp.f32 %v766_v22 }
 0x58f   : > { %v652_v24 = vpop.f32.mrb[8].mxu1 }
 0x590   : > { %v658_v25 = vpack.c.bf16 %v652_v24, %v652_v24  ;;  %v1578_v27 = vpop.f32.mrb[9].mxu1 }
 0x591   : > { %v655_v28 = vpop.f32.mrb[10].mxu1  ;;  %v1502_v27 = vld [vmem:[%s2217_s7] ss:$0 sm:$0xff] }
 0x592   : > { %v1758_v29 = vpop.eup %1757  ;;  %v1579_v31 = vpop.f32.mrb[11].mxu1  ;;  %1583 = vmatmul.mubr.msk.bf16.vlgmr.msra.gmra.mrb[12].mxu1 %vm550_vm2, %v658_v25 }
 0x593   : > { %1593 = vmatpush3.bf16.msra.mxu1 %v776_v30  ;;  %1594 = vmatprep.mubr.msk.bf16.mxu1 %vm1832_vm1, %v1831_v8  ;;  %v768_v32 = vmul.f32 %v1758_v29, %v1756_v18  ;;  %v1503_v29 = vld [vmem:[%s2218_s8] ss:$0 sm:$0xff] }
 0x594   : > { %1598 = vmatprep.subr.bf16.mxu1 %v1831_v8 }
 0x595   : > { %v769_v33 = vpack.c.bf16 %v768_v32, %v768_v32 }
 0x59a   : > { %1595 = vmatmul.mubr.msk.bf16.vlgmr.msra.gmra.mrb[16].mxu1 %vm550_vm2, %v769_v33  ;;  %v1737_v33 = vld [vmem:[%s2221_s11] sm:$0xff]  }
 0x59b   : > { %v971_v34 = vpop.f32.mrb[8].mxu0  ;;  %1600 = vmatprep.mubr.msk.bf16.mxu1 %vm1832_vm1, %v1831_v8  ;;  %1599 = vmatpush3.bf16.msra.mxu1 %v824_v44 }
 0x59c   : > { %v1614_v35 = vpop.f32.mrb[9].mxu0  ;;  %1616 = vmatprep.subr.bf16.mxu1 %v1831_v8 }
 0x59d   : > { %v974_v36 = vpop.f32.mrb[10].mxu0  ;;  %v1739_v35 = vld [vmem:[%s2221_s11 + $0x10] sm:$0xff]  }
 0x59e   : > { %v1615_v37 = vpop.f32.mrb[11].mxu0  ;;  %v1740_v36 = vld [vmem:[%s2221_s11 + $0x18] sm:$0xff]  }
 0x59f   : > { %v1741_v37 = vld [vmem:[%s2221_s11 + $0x20] sm:$0xff]  }
 0x5a3   : > { %v1070_v38 = vpop.f32.mrb[12].mxu0 }
 0x5a4   : > { %v1626_v39 = vpop.f32.mrb[13].mxu0  ;;  %v1076_v40 = vsel %vm550_vm2, %v1070_v38, -inf }
 0x5a5   : > { %v1073_v41 = vpop.f32.mrb[14].mxu0  ;;  %1077 = vmax.xlane.f32.xlu0 %v1076_v40  ;;  %v1743_v39 = vld [vmem:[%s2221_s11 + $0x30] sm:$0xff]   ;;  %v1744_v40 = vld [vmem:[%s2221_s11 + $0x38] sm:$0xff]  }
 0x5a6   : > { %v1627_v42 = vpop.f32.mrb[15].mxu0  ;;  %v1504_v41 = vld [vmem:[%s2220_s10] ss:$0 sm:$0xff] }
 0x632   : > { %v1078_v45 = vpop.xlane.xlu0 %1077 }
 0x633   : > { %v1079_v46 = vsub.f32 %v1070_v38, %v1078_v45  ;;  %v1742_v38 = vld [vmem:[%s2221_s11 + $0x28] sm:$0xff]  }
 0x635   : > { %v1080_v47 = vmul.f32 1.442695, %v1079_v46 }
 0x637   : > { %1759 = vpow2.f32 %v1080_v47 }
 0x641   : > { %v1760_v48 = vpop.eup %1759 }
 0x642   : > { %v1082_v49 = vsel %vm550_vm2, %v1760_v48, 0.0 }
 0x643   : > { %1083 = vadd.xlane.f32.xlu0 %v1082_v49 }
 0x659   : > { %1088 = vrot.lane.b32.xlu0 %v2000_v26, %s1843_s30  ;;  %v977_v26 = vpack.c.bf16 %v971_v34, %v971_v34  ;;  %v1738_v34 = vld [vmem:[%s2221_s11 + $0x8] sm:$0xff]  }
 0x66d   : > { %v812_v51 = vpop.f32.mrb[16].mxu1 }
 0x66e   : > { %v818_v52 = vpack.c.bf16 %v812_v51, %v812_v51  ;;  %v1596_v53 = vpop.f32.mrb[17].mxu1 }
 0x66f   : > { %v815_v55 = vpop.f32.mrb[18].mxu1 }
 0x670   : > { %v1597_v56 = vpop.f32.mrb[19].mxu1  ;;  %1601 = vmatmul.mubr.msk.bf16.vlgmr.msra.gmra.mrb[12].mxu1 %vm550_vm2, %v818_v52 }
 0x671   : > { %1617 = vmatpush3.bf16.msra.mxu1 %v983_v54  ;;  %1618 = vmatprep.mubr.msk.bf16.mxu1 %vm1832_vm1, %v1831_v8  ;;  %v1508_v56 = vld [vmem:[%s2222_s12] ss:$0 sm:$0xff] }
 0x672   : > { %1628 = vmatprep.subr.bf16.mxu1 %v1831_v8 }
 0x67c   : > { %1619 = vmatmul.mubr.msk.bf16.vlgmr.msra.gmra.mrb[12].mxu1 %vm550_vm2, %v977_v26 }
 0x67d   : > { %1630 = vmatprep.mubr.msk.bf16.mxu1 %vm1832_vm1, %v1831_v8 }
 0x6d0   : > { %v1084_v57 = vpop.xlane.xlu0 %1083 }
 0x6d1   : > { %1761 = vrcp.f32 %v1084_v57 }
 0x6d4   : > { %v1089_v58 = vpop.permute.xlu0 %1088 }
 0x6d5   : > { %v1094_v59 = vsel %vm614_vm3, %v1089_v58, 0 }
 0x6d6   : > { %1629 = vmatpush3.bf16.msra.mxu1 %v1094_v59 }
 0x6d7   : > { %1634 = vmatprep.subr.bf16.mxu1 %v1831_v8 }
 0x6db   : > { %v1762_v60 = vpop.eup %1761 }
 0x6dc   : > { %v1086_v62 = vmul.f32 %v1762_v60, %v1760_v48 }
 0x6de   : > { %v1087_v63 = vpack.c.bf16 %v1086_v62, %v1086_v62 }
 0x6e0   : > { %1631 = vmatmul.mubr.msk.bf16.vlgmr.msra.gmra.mrb[20].mxu1 %vm550_vm2, %v1087_v63 }
 0x6e1   : > { %1635 = vmatpush3.bf16.msra.mxu1 %v1142_v1  ;;  %1636 = vmatprep.mubr.msk.bf16.mxu1 %vm1832_vm1, %v1831_v8 }
 0x7b3   : > { %v1130_v2 = vpop.f32.mrb[20].mxu1 }
 0x7b4   : > { %v1136_v3 = vpack.c.bf16 %v1130_v2, %v1130_v2  ;;  %v1632_v4 = vpop.f32.mrb[21].mxu1 }
 0x7b5   : > { %v1133_v5 = vpop.f32.mrb[22].mxu1 }
 0x7b6   : > { %v1633_v6 = vpop.f32.mrb[23].mxu1  ;;  %1637 = vmatmul.mubr.msk.bf16.vlgmr.msra.gmra.mrb[12].mxu1 %vm550_vm2, %v1136_v3 }
 0x889   : > { %v1178_v10 = vpop.f32.mrb[12].mxu1 }
 0x88a   : > { %v2101_v11 = vadd.f32 %v1178_v10, %v546_v9  ;;  %v1638_v12 = vpop.f32.mrb[13].mxu1 }
 0x88b   : > { %v1181_v13 = vpop.f32.mrb[14].mxu1 }
 0x88c   : > { %v1639_v14 = vpop.f32.mrb[15].mxu1  ;;  %v1185_v15 = vsel %vm438_vm0, %v2101_v11, 0.0 }
 0x88d   : > { %1186 = vadd.xlane.f32.xlu1 %v1185_v15 }
 0x91a   : > { %v1187_v16 = vpop.xlane.xlu1 %1186 }
 0x91b   : > { %v1188_v17 = vmul.f32 0.03125, %v1187_v16 }
 0x91d   : > { %v1189_v18 = vsub.f32 %v2101_v11, %v1188_v17 }
 0x91f   : > { %v1190_v19 = vmul.f32 %v1189_v18, %v1189_v18 }
 0x921   : > { %v1191_v20 = vsel %vm438_vm0, %v1190_v19, 0.0 }
 0x922   : > { %1192 = vadd.xlane.f32.xlu0 %v1191_v20 }
 0x9af   : > { %v1193_v22 = vpop.xlane.xlu0 %1192 }
 0x9b0   : > { %v1194_v23 = vmul.f32 0.03125, %v1193_v22 }
 0x9b2   : > { %v1195_v24 = vadd.f32 1e-05, %v1194_v23 }
 0x9b4   : > { %1763 = vrsqrt.f32 %v1195_v24 }
 0x9be   : > { %v1764_v25 = vpop.eup %1763 }
 0x9bf   : > { %v1197_v28 = vmul.f32 %v1764_v25, %v1189_v18 }
 0x9c1   : > { %v1205_v30 = vmul.f32 %v1502_v27, %v1197_v28 }
 0x9c3   : > { %v1213_v31 = vadd.f32 %v1503_v29, %v1205_v30 }
 0x9c5   : > { %v1214_v32 = vpack.c.bf16 %v1213_v31, %v1213_v31 }
 0x9c7   : > { %1645 = vmatmul.mubr.msk.bf16.vlgmr.msra.gmra.mrb[16].mxu0 %vm438_vm0, %v1214_v32 }
 0x9c8   : > { %1664 = vmatprep.mubr.msk.bf16.mxu0 %vm1832_vm1, %v1831_v8  ;;  %1649 = vmatpush3.bf16.msra.mxu0 %v1737_v33 }
 0x9c9   : > { %1650 = vmatprep.subr.bf16.mxu0 %v1831_v8 }
 0x9cc   : > { %1651 = vmatpush3.bf16.msra.mxu0 %v1738_v34 }
 0x9cd   : > { %1652 = vmatprep.subr.bf16.mxu0 %v1831_v8 }
 0x9d0   : > { %1653 = vmatpush3.bf16.msra.mxu0 %v1739_v35 }
 0x9d1   : > { %1654 = vmatprep.subr.bf16.mxu0 %v1831_v8 }
 0x9d4   : > { %1655 = vmatpush3.bf16.msra.mxu0 %v1740_v36 }
 0x9d5   : > { %1656 = vmatprep.subr.bf16.mxu0 %v1831_v8 }
 0x9d8   : > { %1657 = vmatpush3.bf16.msra.mxu0 %v1741_v37 }
 0x9d9   : > { %1658 = vmatprep.subr.bf16.mxu0 %v1831_v8 }
 0x9dc   : > { %1659 = vmatpush3.bf16.msra.mxu0 %v1742_v38 }
 0x9dd   : > { %1660 = vmatprep.subr.bf16.mxu0 %v1831_v8 }
 0x9e0   : > { %1661 = vmatpush3.bf16.msra.mxu0 %v1743_v39 }
 0x9e1   : > { %1662 = vmatprep.subr.bf16.mxu0 %v1831_v8 }
 0x9e4   : > { %1663 = vmatpush3.bf16.msra.mxu0 %v1744_v40 }
 0xa9a   : > { %v1275_v42 = vpop.f32.mrb[16].mxu0 }
 0xa9b   : > { %v1276_v43 = vadd.f32 %v1504_v41, %v1275_v42  ;;  %v1646_v44 = vpop.f32.mrb[17].mxu0 }
 0xa9c   : > { %v1278_v45 = vpop.f32.mrb[18].mxu0 }
 0xa9d   : > { %v1281_v46 = vmul.f32 %v1276_v43, %v1276_v43  ;;  %v1647_v47 = vpop.f32.mrb[19].mxu0 }
 0xa9f   : > { %v1282_v48 = vmul.f32 %v1281_v46, %v1276_v43 }
 0xaa1   : > { %v1283_v49 = vmul.f32 0.044715, %v1282_v48 }
 0xaa3   : > { %v1284_v50 = vadd.f32 %v1283_v49, %v1276_v43 }
 0xaa5   : > { %v1285_v51 = vmul.f32 0.7978846, %v1284_v50 }
 0xaa7   : > { %1765 = vtanh.f32 %v1285_v51 }
 0xab1   : > { %v1766_v52 = vpop.eup %1765 }
 0xab2   : > { %v1287_v8 = vadd.f32 1.0, %v1766_v52 }
 0xab4   : > { %v1288_v53 = vmul.f32 0.5, %v1287_v8 }
 0xab6   : > { %v1289_v54 = vmul.f32 %v1288_v53, %v1276_v43 }
 0xab8   : > { %v1290_v55 = vpack.c.bf16 %v1289_v54, %v1289_v54 }
 0xaba   : > { %1665 = vmatmul.mubr.bf16.vlgmr.msra.gmra.mrb[20].mxu0 %v1290_v55 }
 0xb8d   : > { %v1396_v26 = vpop.f32.mrb[20].mxu0 }
 0xb8e   : > { %v1397_v57 = vadd.f32 %v1508_v56, %v1396_v26  ;;  %v1666_v58 = vpop.f32.mrb[21].mxu0 }
 0xb8f   : > { %v1399_v59 = vpop.f32.mrb[22].mxu0 }
 0xb90   : > { %v1402_v60 = vadd.f32 %v2101_v11, %v1397_v57  ;;  %v1667_v61 = vpop.f32.mrb[23].mxu0 }
 0xb92   : > { %1403 = vst.msk [vmem:[%s431_s23] sm:$0xff] %vm438_vm0, %v1402_v60 }
 0xb93   : > { %1780 = shalt.err (!%p1777_p3)
}
 0xb94   : > { %s1781_s0 = scalar_lea.hbm %s2167_s1, 128  ;;  %s1785_s23 = scalar_lea.hbm %s2223_s13, 256 }
 0xb95   : > { %p1782_p4 = scmp.ne.s32.totalorder %s2167_s1, %s1781_s0  ;;  %p1786_p9 = scmp.lt.u32.totalorder %s2167_s1, %s2223_s13 }
 0xb96   : > { %p1787_p10 = scmp.lt.u32.totalorder %s1785_s23, %s1781_s0  ;;  %p1789_p12 = scmp.lt.u32.totalorder %s1781_s0, %s2167_s1 }
 0xb97   : > { %p1783_p7 = pnand %p1782_p4, %p1953_p5 }
 0xb98   : > { %p1788_p11 = por %p1787_p10, %p1786_p9 }
 0xb99   : > { %p1784_p8 = pneg %p1783_p7 }
 0xb9a   : > { %p1790_p13 = por %p1789_p12, %p1788_p11 }
 0xb9c   : > { %p1791_p0 = pnand %p1790_p13, %p1784_p8 }
 0xb9e   : > { %1794 = shalt.err (!%p1791_p0)
}
 0xb9f   : > { %1681 = dma.vmem_to_hbm [thread:$0]  (%p1953_p5), %s2169_s24, 128, %s2167_s1, %s1405_s29  }
 0xba0 PF: > { %p1687_p1 = scmp.ge.s32.totalorder %s1829_s28, 2  ;;  %s1430_s2 = sand.u32 1, %s1817_s25  }
 0xba1   : > { %s1431_s16 = scalar_lea.sflag [#allocation3], %s1430_s2 }
 0xba2   : > { %p1684_p2 = pnand %p1687_p1, %p1957_p6 }
 0xba4   : > { %1812 = dma.done.wait (!%p1684_p2), %s1431_s16, 128  }
 0xba5   : > { %1814 = vsyncadd (!%p1684_p2), %s1431_s16, 4294967168  ;;  %p23_p3 = scmp.ge.s32.totalorder %s1940_s14, 4   ;;  %s2232_s25 = smov %s1821_s26 }
 0xba6   : > { %s2233_s26 = smov %s1825_s27  ;;  %s2234_s27 = smov %s1951_s17 }
 0xba7   : > { %s2235_s28 = smov %s1940_s14  ;;  %25 = sbr.rel (!%p23_p3) target bundleno = 7 (0x7), region = 107 }
 0xbae   :  { %1436 = vsyncpa [#allocation3], 1 }
 0xbaf   :  { %1438 = vsyncpa [#allocation3 + $0x1], 1 }

// kernel: tpu_custom_call.1
= control target key start
LH: loop header
LB: loop body
LE: loop exit
PB: predicated region body
PF: predicated region fallthrough
CT: control target
= control target key end

     0   :  { %s2210_s0 = inlined_call_operand.vmem [shape: f32[2,8,32], index: 0, kind: input, shape index: {}]   ;;  %s2211_s1 = inlined_call_operand.vmem [shape: f32[1,32], index: 1, kind: input, shape index: {}]   ;;  %s2212_s2 = inlined_call_operand.vmem [shape: f32[1,32], index: 2, kind: input, shape index: {}]   ;;  %s2213_s3 = inlined_call_operand.vmem [shape: bf16[32,96], index: 3, kind: input, shape index: {}]   ;;  %s2214_s4 = inlined_call_operand.vmem [shape: f32[1,96], index: 4, kind: input, shape index: {}]   ;;  %s2215_s5 = inlined_call_operand.vmem [shape: bf16[32,32], index: 5, kind: input, shape index: {}]   ;;  %s2216_s6 = inlined_call_operand.vmem [shape: f32[1,32], index: 6, kind: input, shape index: {}]   ;;  %s2217_s7 = inlined_call_operand.vmem [shape: f32[1,32], index: 7, kind: input, shape index: {}]   ;;  %s2218_s8 = inlined_call_operand.vmem [shape: f32[1,32], index: 8, kind: input, shape index: {}]   ;;  %s2219_s9 = inlined_call_operand.vmem [shape: bf16[32,128], index: 9, kind: input, shape index: {}]   ;;  %s2220_s10 = inlined_call_operand.vmem [shape: f32[1,128], index: 10, kind: input, shape index: {}]   ;;  %s2221_s11 = inlined_call_operand.vmem [shape: bf16[128,32], index: 11, kind: input, shape index: {}]   ;;  %s2222_s12 = inlined_call_operand.vmem [shape: f32[1,32], index: 12, kind: input, shape index: {}]   ;;  %s2223_s13 = inlined_call_operand.hbm [shape: f32[2,8,32], index: 13, kind: output, shape index: {}]  }
   0x1   :  { %2224 = sst [smem:[#allocation5_spill]] %s2210_s0 }
   0x2   :  { %2225 = sst [smem:[#allocation6_spill]] %s2211_s1 }
   0x3   :  { %2226 = sst [smem:[#allocation7_spill]] %s2212_s2 }
   0x4   :  { %18 = vsyncpa [#allocation3], 0 }
   0x5   :  { %20 = vsyncpa [#allocation3 + $0x1], 0  ;;  %s1915_s25 = smov 0   ;;  %s1917_s26 = smov 0  }
   0x6   :  { %s1919_s27 = smov 0   ;;  %s1921_s28 = smov 0  }
   0x7 LB: > { %s1936_s29 = sadd.s32 4294967295, %s1829_s28   ;;  %s1477_s30 = sadd.s32 4294967294, %s1829_s28   ;;  %s1829_s28 = sphi %s1921_s28, %s2235_s28   ;;  %s1825_s27 = sphi %s1919_s27, %s2234_s27   ;;  %s1821_s26 = sphi %s1917_s26, %s2233_s26   ;;  %s1817_s25 = sphi %s1915_s25, %s2232_s25  }
   0x8   : > { %s1940_s14 = sadd.s32 1, %s1829_s28   ;;  %s311_s15 = sadd.s32 1, %s1825_s27 }
   0x9   : > { %s308_s16 = ssub.s32 %s1829_s28, %s1940_s14  ;;  %p321_p0 = scmp.ne.s32.totalorder %s1825_s27, %s1821_s26 }
   0xa   : > { %p309_p1 = scmp.eq.s32.totalorder %s308_s16, 0  ;;  %p322_p2 = scmp.eq.s32.totalorder %s1936_s29, 1 }
   0xb   : > { %p327_p3 = scmp.ne.s32.totalorder %s1821_s26, %s1817_s25  ;;  %p328_p4 = scmp.eq.s32.totalorder %s1477_s30, 1 }
   0xc   : > { %s1951_s17 = scalar_select %p309_p1, %s1825_s27, %s311_s15  }
   0xd   : > { %p1953_p5 = por %p322_p2, %p321_p0  ;;  %p1957_p6 = por %p328_p4, %p327_p3 }
   0xe   : > { %p1480_p7 = scmp.ge.s32.totalorder %s1829_s28, 1  ;;  %p389_p8 = scmp.lt.s32.totalorder %s1829_s28, 3 }
  0x10   : > { %p390_p9 = pnand %p1480_p7, %p389_p8 }
  0x11   : > { %p432_p10 = scmp.lt.s32.totalorder (!%p390_p9), %s1936_s29, 1  ;;  %vm438_vm0 = vcmask (!%p390_p9), 261120   ;;  %s2229_s0 = sld [smem:[#allocation5_spill]] (!%p390_p9)  ;;  %v1733_v7 = vld [vmem:[%s2213_s3] sm:$0xff] (!%p390_p9)   ;;  %v1831_v8 = vmov (!%p390_p9), 0.0   ;;  %vm1832_vm1 = vmmov (!%p390_p9), 0  }
  0x12   : > { %393 = sbr.rel (%p390_p9) target bundleno = 2976 (0xba0), region = 72  ;;  %1560 = vmatprep.subr.bf16.mxu1 (!%p390_p9), %v1831_v8  ;;  %1564 = vmatprep.mubr.msk.bf16.mxu1 (!%p390_p9), %vm1832_vm1, %v1831_v8  ;;  %v1734_v9 = vld [vmem:[%s2213_s3 + $0x8] sm:$0xff] (!%p390_p9)   ;;  %s2230_s1 = sld [smem:[#allocation6_spill]] (!%p390_p9)  ;;  %v1485_v20 = vld [vmem:[%s2214_s4] ss:$0 sm:$0xff] (!%p390_p9)  ;;  %vm550_vm2 = vcmask (!%p390_p9), 64512  }
  0x13   : > { %1561 = vmatpush3.bf16.msra.mxu1 (!%p390_p9), %v1733_v7  ;;  %1586 = vmatprep.subr.bf16.mxu0 (!%p390_p9), %v1831_v8  ;;  %s2231_s2 = sld [smem:[#allocation7_spill]] (!%p390_p9)  ;;  %s1833_s16 = smov (!%p390_p9), 96   ;;  %vm614_vm3 = vcmask (!%p390_p9), 1043456  }
  0x14   : > { %1562 = vmatprep.subr.bf16.mxu1 (!%p390_p9), %v1831_v8  ;;  %1588 = vmatprep.mubr.msk.bf16.mxu0 (!%p390_p9), %vm1832_vm1, %v1831_v8  ;;  %s1836_s22 = smov (!%p390_p9), 80   ;;  %s1837_s23 = smov (!%p390_p9), 112  }
  0x15   : > { %s1839_s30 = smov (!%p390_p9), 72   ;;  %s1840_s15 = smov (!%p390_p9), 104  }
  0x17   : > { %1563 = vmatpush3.bf16.msra.mxu1 (!%p390_p9), %v1734_v9 }
  0x18   : > { %1568 = vmatprep.subr.bf16.mxu1 (!%p390_p9), %v1831_v8  ;;  %v1483_v14 = vld [vmem:[%s2230_s1] ss:$0 sm:$0xff] (!%p390_p9) }
  0x19   : > { %s433_s20 = scalar_select %p432_p10, %s1936_s29, 1  ;;  %v1484_v16 = vld [vmem:[%s2231_s2] ss:$0 sm:$0xff] }
  0x1b   : > { %s1482_s21 = sshll.u32 %s433_s20, 3  ;;  %s1834_s20 = smov 120  }
  0x1c   : > { %s435_s24 = scalar_lea.vmem %s2229_s0, %s1482_s21  ;;  %s1835_s21 = smov 88  }
  0x1d   : > { %v1968_v0 = vld [vmem:[%s435_s24] sm:$0xff]  ;;  %s1838_s24 = smov 64  }
  0x1e   : > { %v439_v1 = vsel %vm438_vm0, %v1968_v0, 0.0 }
  0x1f   : > { %440 = vadd.xlane.f32.xlu0 %v439_v1 }
  0xac   : > { %v441_v2 = vpop.xlane.xlu0 %440 }
  0xad   : > { %v443_v3 = vmul.f32 0.03125, %v441_v2 }
  0xaf   : > { %v444_v4 = vsub.f32 %v1968_v0, %v443_v3 }
  0xb1   : > { %v445_v5 = vmul.f32 %v444_v4, %v444_v4 }
  0xb3   : > { %v446_v6 = vsel %vm438_vm0, %v445_v5, 0.0 }
  0xb4   : > { %447 = vadd.xlane.f32.xlu0 %v446_v6 }
 0x141   : > { %v448_v10 = vpop.xlane.xlu0 %447 }
 0x142   : > { %v449_v11 = vmul.f32 0.03125, %v448_v10 }
 0x144   : > { %v450_v12 = vadd.f32 1e-05, %v449_v11 }
 0x146   : > { %1745 = vrsqrt.f32 %v450_v12 }
 0x150   : > { %v1746_v13 = vpop.eup %1745 }
 0x151   : > { %v452_v15 = vmul.f32 %v1746_v13, %v444_v4 }
 0x153   : > { %v460_v17 = vmul.f32 %v1483_v14, %v452_v15 }
 0x155   : > { %v468_v18 = vadd.f32 %v1484_v16, %v460_v17 }
 0x157   : > { %v469_v19 = vpack.c.bf16 %v468_v18, %v468_v18 }
 0x159   : > { %1565 = vmatmul.mubr.msk.bf16.vlgmr.msra.gmra.mrb[0].mxu1 %vm438_vm0, %v469_v19 }
 0x15a   : > { %1570 = vmatprep.mubr.msk.bf16.mxu1 %vm1832_vm1, %v1831_v8 }
 0x22c   : > { %v530_v21 = vpop.f32.mrb[0].mxu1 }
 0x22d   : > { %v531_v22 = vadd.f32 %v1485_v20, %v530_v21  ;;  %v1566_v23 = vpop.f32.mrb[1].mxu1  ;;  %v659_v20 = vld [vmem:[%s2215_s5] sm:$0xf] }
 0x22e   : > { %v533_v24 = vpop.f32.mrb[2].mxu1  ;;  %v664_v21 = vsel %vm614_vm3, %v659_v20, 0 }
 0x22f   : > { %v536_v25 = vmul.f32 0.35355338, %v531_v22  ;;  %v2000_v26 = vpack.c.bf16 %v531_v22, %v531_v22  ;;  %v1567_v27 = vpop.f32.mrb[3].mxu1 }
 0x231   : > { %v2002_v28 = vpack.c.bf16 %v536_v25, %v536_v25  ;;  %548 = vrot.lane.b32.xlu1 %v2000_v26, %s1833_s16  ;;  %s1841_s16 = smov 48  }
 0x233   : > { %708 = vrot.lane.b32.xlu0 %v2002_v28, %s1834_s20  ;;  %s1842_s20 = smov 56  }
 0x235   : > { %710 = vrot.lane.b32.xlu1 %v2000_v26, %s1835_s21 }
 0x239   : > { %869 = vrot.lane.b32.xlu1 %v2000_v26, %s1836_s22  ;;  %s1518_s22 = sshll.u32 %s1936_s29, 7 }
 0x23a   : > { %s2167_s1 = scalar_lea.hbm %s2223_s13, %s1518_s22 }
 0x23d   : > { %867 = vrot.lane.b32.xlu1 %v2002_v28, %s1837_s23 }
 0x2a3   : > { %v549_v29 = vpop.permute.xlu1 %548 }
 0x2a4   : > { %v555_v30 = vsel %vm550_vm2, %v549_v29, 0 }
 0x2a5   : > { %1569 = vmatpush3.bf16.xpose.msra.mxu1 %v555_v30  ;;  %v709_v34 = vpop.permute.xlu0 %708 }
 0x2a6   : > { %1574 = vmatprep.subr.bf16.mxu1 %v1831_v8 }
 0x2a7   : > { %v711_v31 = vpop.permute.xlu1 %710 }
 0x2a8   : > { %v716_v32 = vsel %vm550_vm2, %v711_v31, 0 }
 0x2a9   : > { %1587 = vmatpush3.bf16.xpose.msra.mxu0 %v716_v32 }
 0x2aa   : > { %1604 = vmatprep.subr.bf16.mxu0 %v1831_v8 }
 0x2ab   : > { %v870_v33 = vpop.permute.xlu1 %869 }
 0x2ac   : > { %1571 = vmatmul.mubr.msk.bf16.vlgmr.msra.gmra.mrb[4].mxu1 %vm550_vm2, %v2002_v28  ;;  %v875_v35 = vsel %vm550_vm2, %v870_v33, 0 }
 0x2ad   : > { %1576 = vmatprep.mubr.msk.bf16.mxu1 %vm1832_vm1, %v1831_v8 }
 0x2af   : > { %v868_v36 = vpop.permute.xlu1 %867 }
 0x2b0   : > { %1589 = vmatmul.mubr.msk.bf16.vlgmr.msra.gmra.mrb[0].mxu0 %vm550_vm2, %v709_v34 }
 0x2b1   : > { %1605 = vmatpush3.bf16.xpose.msra.mxu0 %v875_v35  ;;  %1606 = vmatprep.mubr.msk.bf16.mxu0 %vm1832_vm1, %v1831_v8 }
 0x2b2   : > { %1610 = vmatprep.subr.bf16.mxu0 %v1831_v8 }
 0x2b8   : > { %1607 = vmatmul.mubr.msk.bf16.vlgmr.msra.gmra.mrb[4].mxu0 %vm550_vm2, %v868_v36 }
 0x2b9   : > { %1612 = vmatprep.mubr.msk.bf16.mxu0 %vm1832_vm1, %v1831_v8 }
 0x37f   : > { %v591_v37 = vpop.f32.mrb[4].mxu1 }
 0x380   : > { %v1572_v38 = vpop.f32.mrb[5].mxu1  ;;  %v597_v39 = vsel %vm550_vm2, %v591_v37, -inf }
 0x381   : > { %598 = vmax.xlane.f32.xlu1 %v597_v39  ;;  %v594_v40 = vpop.f32.mrb[6].mxu1 }
 0x382   : > { %v1573_v41 = vpop.f32.mrb[7].mxu1 }
 0x383   : > { %v2026_v42 = vpop.f32.mrb[0].mxu0 }
 0x384   : > { %v1590_v43 = vpop.f32.mrb[1].mxu0  ;;  %v758_v61 = vsel %vm550_vm2, %v2026_v42, -inf }
 0x385   : > { %v755_v44 = vpop.f32.mrb[2].mxu0  ;;  %v819_v43 = vld [vmem:[%s2215_s5 + $0x4] sm:$0xf] }
 0x386   : > { %v1591_v45 = vpop.f32.mrb[3].mxu0  ;;  %v824_v44 = vsel %vm614_vm3, %v819_v43, 0 }
 0x38b   : > { %v911_v46 = vpop.f32.mrb[4].mxu0 }
 0x38c   : > { %v1608_v47 = vpop.f32.mrb[5].mxu0  ;;  %v917_v48 = vsel %vm550_vm2, %v911_v46, -inf }
 0x38d   : > { %918 = vmax.xlane.f32.xlu0 %v917_v48  ;;  %v914_v49 = vpop.f32.mrb[6].mxu0 }
 0x38e   : > { %v1609_v50 = vpop.f32.mrb[7].mxu0 }
 0x38f   : > { %v978_v50 = vld [vmem:[%s2215_s5 + $0x8] sm:$0xf] }
 0x40e   : > { %v599_v51 = vpop.xlane.xlu1 %598 }
 0x40f   : > { %v600_v52 = vsub.f32 %v591_v37, %v599_v51 }
 0x411   : > { %v601_v53 = vmul.f32 1.442695, %v600_v52 }
 0x413   : > { %1747 = vpow2.f32 %v601_v53 }
 0x41a   : > { %v919_v54 = vpop.xlane.xlu0 %918 }
 0x41b   : > { %v920_v55 = vsub.f32 %v911_v46, %v919_v54  ;;  %v983_v54 = vsel %vm614_vm3, %v978_v50, 0 }
 0x41d   : > { %v1748_v56 = vpop.eup %1747  ;;  %v921_v57 = vmul.f32 1.442695, %v920_v55 }
 0x41e   : > { %v603_v58 = vsel %vm550_vm2, %v1748_v56, 0.0 }
 0x41f   : > { %1749 = vpow2.f32 %v921_v57  ;;  %604 = vadd.xlane.f32.xlu1 %v603_v58 }
 0x429   : > { %v1750_v59 = vpop.eup %1749 }
 0x42a   : > { %v923_v60 = vsel %vm550_vm2, %v1750_v59, 0.0 }
 0x42b   : > { %924 = vadd.xlane.f32.xlu0 %v923_v60 }
 0x430   : > { %609 = vrot.lane.b32.xlu1 %v2000_v26, %s1838_s24 }
 0x434   : > { %1028 = vrot.lane.b32.xlu1 %v2000_v26, %s1839_s30  ;;  %s1843_s30 = smov 40  }
 0x438   : > { %1026 = vrot.lane.b32.xlu1 %v2002_v28, %s1840_s15  ;;  %s429_s15 = sand.u32 1, %s1821_s26  }
 0x439   : > { %s1405_s29 = scalar_lea.sflag [#allocation3], %s429_s15 }
 0x441   : > { %929 = vrot.lane.b32.xlu0 %v2000_v26, %s1841_s16  ;;  %s1481_s16 = sshll.u32 %s429_s15, 3 }
 0x442   : > { %s431_s23 = scalar_lea.vmem [#allocation2], %s1481_s16 }
 0x443   : > { %s1418_s24 = sshll.u32 %s431_s23, 4  ;;  %s2169_s24 = int_to_ptr.vmem [resolvable:$true] %s1418_s24 }
 0x444   : > { %s1767_s16 = scalar_lea.vmem %s2169_s24, 128 }
 0x445   : > { %p1768_p11 = scmp.ne.s32.totalorder %s2169_s24, %s1767_s16 }
 0x447   : > { %p1769_p12 = pnand %p1768_p11, %p1953_p5 }
 0x449   : > { %p1770_p13 = pneg %p1769_p12 }
 0x45c   : > { %759 = vmax.xlane.f32.xlu1 %v758_v61  ;;  %v1137_v61 = vld [vmem:[%s2215_s5 + $0xc] sm:$0xf] }
 0x46d   : > { %770 = vrot.lane.b32.xlu1 %v2000_v26, %s1842_s20  ;;  %s1844_s20 = smov [#allocation2]  }
 0x46e   : > { %s1771_s21 = sshll.u32 %s1844_s20, 4  ;;  %s1772_s21 = int_to_ptr.vmem [resolvable:$false] %s1771_s21 }
 0x46f   : > { %s1773_s2 = scalar_lea.vmem %s1772_s21, 256  ;;  %p1774_p0 = scmp.lt.s32.totalorder %s2169_s24, %s1772_s21 }
 0x470   : > { %p1775_p1 = scmp.lt.s32.totalorder %s1773_s2, %s1767_s16 }
 0x472   : > { %p1776_p2 = por %p1775_p1, %p1774_p0 }
 0x474   : > { %p1777_p3 = pnand %p1776_p2, %p1770_p13 }
 0x4ac   : > { %v605_v62 = vpop.xlane.xlu1 %604 }
 0x4ad   : > { %1751 = vrcp.f32 %v605_v62 }
 0x4b0   : > { %v610_v63 = vpop.permute.xlu1 %609 }
 0x4b1   : > { %v616_v1 = vsel %vm614_vm3, %v610_v63, 0 }
 0x4b2   : > { %1575 = vmatpush3.bf16.msra.mxu1 %v616_v1  ;;  %v1142_v1 = vsel %vm614_vm3, %v1137_v61, 0 }
 0x4b3   : > { %1580 = vmatprep.subr.bf16.mxu1 %v1831_v8 }
 0x4b4   : > { %v1029_v11 = vpop.permute.xlu1 %1028 }
 0x4b5   : > { %v1034_v13 = vsel %vm550_vm2, %v1029_v11, 0 }
 0x4b7   : > { %v1752_v2 = vpop.eup %1751 }
 0x4b8   : > { %v607_v3 = vmul.f32 %v1752_v2, %v1748_v56  ;;  %v925_v4 = vpop.xlane.xlu0 %924  ;;  %v1027_v14 = vpop.permute.xlu1 %1026 }
 0x4b9   : > { %1753 = vrcp.f32 %v925_v4 }
 0x4ba   : > { %v608_v5 = vpack.c.bf16 %v607_v3, %v607_v3 }
 0x4bc   : > { %v930_v6 = vpop.permute.xlu0 %929  ;;  %1577 = vmatmul.mubr.msk.bf16.vlgmr.msra.gmra.mrb[8].mxu1 %vm550_vm2, %v608_v5 }
 0x4bd   : > { %v935_v7 = vsel %vm614_vm3, %v930_v6, 0  ;;  %1582 = vmatprep.mubr.msk.bf16.mxu1 %vm1832_vm1, %v1831_v8  ;;  %1581 = vmatpush3.bf16.msra.mxu1 %v664_v21  ;;  %v1736_v21 = vld [vmem:[%s2219_s9 + $0x8] sm:$0xff]  }
 0x4be   : > { %1611 = vmatpush3.bf16.msra.mxu0 %v935_v7  ;;  %1592 = vmatprep.subr.bf16.mxu1 %v1831_v8  ;;  %v1489_v7 = vld [vmem:[%s2216_s6] ss:$0 sm:$0xff] }
 0x4bf   : > { %1622 = vmatprep.subr.bf16.mxu0 %v1831_v8 }
 0x4c3   : > { %v1754_v9 = vpop.eup %1753 }
 0x4c4   : > { %v927_v10 = vmul.f32 %v1754_v9, %v1750_v59  ;;  %v546_v9 = vadd.f32 %v1489_v7, %v1968_v0  ;;  %v1735_v0 = vld [vmem:[%s2219_s9] sm:$0xff]  }
 0x4c6   : > { %v928_v12 = vpack.c.bf16 %v927_v10, %v927_v10 }
 0x4c8   : > { %1613 = vmatmul.mubr.msk.bf16.vlgmr.msra.gmra.mrb[8].mxu0 %vm550_vm2, %v928_v12 }
 0x4c9   : > { %1623 = vmatpush3.bf16.xpose.msra.mxu0 %v1034_v13  ;;  %1624 = vmatprep.mubr.msk.bf16.mxu0 %vm1832_vm1, %v1831_v8 }
 0x4ca   : > { %1640 = vmatprep.subr.bf16.mxu0 %v1831_v8 }
 0x4d0   : > { %1625 = vmatmul.mubr.msk.bf16.vlgmr.msra.gmra.mrb[12].mxu0 %vm550_vm2, %v1027_v14 }
 0x4d1   : > { %1644 = vmatprep.mubr.msk.bf16.mxu0 %vm1832_vm1, %v1831_v8  ;;  %1641 = vmatpush3.bf16.msra.mxu0 %v1735_v0 }
 0x4d2   : > { %1642 = vmatprep.subr.bf16.mxu0 %v1831_v8 }
 0x4d5   : > { %1643 = vmatpush3.bf16.msra.mxu0 %v1736_v21 }
 0x4d6   : > { %1648 = vmatprep.subr.bf16.mxu0 %v1831_v8 }
 0x4e9   : > { %v760_v15 = vpop.xlane.xlu1 %759 }
 0x4ea   : > { %v761_v16 = vsub.f32 %v2026_v42, %v760_v15 }
 0x4ec   : > { %v762_v17 = vmul.f32 1.442695, %v761_v16 }
 0x4ed   : > { %v771_v23 = vpop.permute.xlu1 %770 }
 0x4ee   : > { %1755 = vpow2.f32 %v762_v17  ;;  %v776_v30 = vsel %vm614_vm3, %v771_v23, 0 }
 0x4f8   : > { %v1756_v18 = vpop.eup %1755 }
 0x4f9   : > { %v764_v19 = vsel %vm550_vm2, %v1756_v18, 0.0 }
 0x4fa   : > { %765 = vadd.xlane.f32.xlu0 %v764_v19 }
 0x587   : > { %v766_v22 = vpop.xlane.xlu0 %765 }
 0x588   : > { %1757 = vrcp.f32 %v766_v22 }
 0x58f   : > { %v652_v24 = vpop.f32.mrb[8].mxu1 }
 0x590   : > { %v658_v25 = vpack.c.bf16 %v652_v24, %v652_v24  ;;  %v1578_v27 = vpop.f32.mrb[9].mxu1 }
 0x591   : > { %v655_v28 = vpop.f32.mrb[10].mxu1  ;;  %v1502_v27 = vld [vmem:[%s2217_s7] ss:$0 sm:$0xff] }
 0x592   : > { %v1758_v29 = vpop.eup %1757  ;;  %v1579_v31 = vpop.f32.mrb[11].mxu1  ;;  %1583 = vmatmul.mubr.msk.bf16.vlgmr.msra.gmra.mrb[12].mxu1 %vm550_vm2, %v658_v25 }
 0x593   : > { %1593 = vmatpush3.bf16.msra.mxu1 %v776_v30  ;;  %1594 = vmatprep.mubr.msk.bf16.mxu1 %vm1832_vm1, %v1831_v8  ;;  %v768_v32 = vmul.f32 %v1758_v29, %v1756_v18  ;;  %v1503_v29 = vld [vmem:[%s2218_s8] ss:$0 sm:$0xff] }
 0x594   : > { %1598 = vmatprep.subr.bf16.mxu1 %v1831_v8 }
 0x595   : > { %v769_v33 = vpack.c.bf16 %v768_v32, %v768_v32 }
 0x59a   : > { %1595 = vmatmul.mubr.msk.bf16.vlgmr.msra.gmra.mrb[16].mxu1 %vm550_vm2, %v769_v33  ;;  %v1737_v33 = vld [vmem:[%s2221_s11] sm:$0xff]  }
 0x59b   : > { %v971_v34 = vpop.f32.mrb[8].mxu0  ;;  %1600 = vmatprep.mubr.msk.bf16.mxu1 %vm1832_vm1, %v1831_v8  ;;  %1599 = vmatpush3.bf16.msra.mxu1 %v824_v44 }
 0x59c   : > { %v1614_v35 = vpop.f32.mrb[9].mxu0  ;;  %1616 = vmatprep.subr.bf16.mxu1 %v1831_v8 }
 0x59d   : > { %v974_v36 = vpop.f32.mrb[10].mxu0  ;;  %v1739_v35 = vld [vmem:[%s2221_s11 + $0x10] sm:$0xff]  }
 0x59e   : > { %v1615_v37 = vpop.f32.mrb[11].mxu0  ;;  %v1740_v36 = vld [vmem:[%s2221_s11 + $0x18] sm:$0xff]  }
 0x59f   : > { %v1741_v37 = vld [vmem:[%s2221_s11 + $0x20] sm:$0xff]  }
 0x5a3   : > { %v1070_v38 = vpop.f32.mrb[12].mxu0 }
 0x5a4   : > { %v1626_v39 = vpop.f32.mrb[13].mxu0  ;;  %v1076_v40 = vsel %vm550_vm2, %v1070_v38, -inf }
 0x5a5   : > { %v1073_v41 = vpop.f32.mrb[14].mxu0  ;;  %1077 = vmax.xlane.f32.xlu0 %v1076_v40  ;;  %v1743_v39 = vld [vmem:[%s2221_s11 + $0x30] sm:$0xff]   ;;  %v1744_v40 = vld [vmem:[%s2221_s11 + $0x38] sm:$0xff]  }
 0x5a6   : > { %v1627_v42 = vpop.f32.mrb[15].mxu0  ;;  %v1504_v41 = vld [vmem:[%s2220_s10] ss:$0 sm:$0xff] }
 0x632   : > { %v1078_v45 = vpop.xlane.xlu0 %1077 }
 0x633   : > { %v1079_v46 = vsub.f32 %v1070_v38, %v1078_v45  ;;  %v1742_v38 = vld [vmem:[%s2221_s11 + $0x28] sm:$0xff]  }
 0x635   : > { %v1080_v47 = vmul.f32 1.442695, %v1079_v46 }
 0x637   : > { %1759 = vpow2.f32 %v1080_v47 }
 0x641   : > { %v1760_v48 = vpop.eup %1759 }
 0x642   : > { %v1082_v49 = vsel %vm550_vm2, %v1760_v48, 0.0 }
 0x643   : > { %1083 = vadd.xlane.f32.xlu0 %v1082_v49 }
 0x659   : > { %1088 = vrot.lane.b32.xlu0 %v2000_v26, %s1843_s30  ;;  %v977_v26 = vpack.c.bf16 %v971_v34, %v971_v34  ;;  %v1738_v34 = vld [vmem:[%s2221_s11 + $0x8] sm:$0xff]  }
 0x66d   : > { %v812_v51 = vpop.f32.mrb[16].mxu1 }
 0x66e   : > { %v818_v52 = vpack.c.bf16 %v812_v51, %v812_v51  ;;  %v1596_v53 = vpop.f32.mrb[17].mxu1 }
 0x66f   : > { %v815_v55 = vpop.f32.mrb[18].mxu1 }
 0x670   : > { %v1597_v56 = vpop.f32.mrb[19].mxu1  ;;  %1601 = vmatmul.mubr.msk.bf16.vlgmr.msra.gmra.mrb[12].mxu1 %vm550_vm2, %v818_v52 }
 0x671   : > { %1617 = vmatpush3.bf16.msra.mxu1 %v983_v54  ;;  %1618 = vmatprep.mubr.msk.bf16.mxu1 %vm1832_vm1, %v1831_v8  ;;  %v1508_v56 = vld [vmem:[%s2222_s12] ss:$0 sm:$0xff] }
 0x672   : > { %1628 = vmatprep.subr.bf16.mxu1 %v1831_v8 }
 0x67c   : > { %1619 = vmatmul.mubr.msk.bf16.vlgmr.msra.gmra.mrb[12].mxu1 %vm550_vm2, %v977_v26 }
 0x67d   : > { %1630 = vmatprep.mubr.msk.bf16.mxu1 %vm1832_vm1, %v1831_v8 }
 0x6d0   : > { %v1084_v57 = vpop.xlane.xlu0 %1083 }
 0x6d1   : > { %1761 = vrcp.f32 %v1084_v57 }
 0x6d4   : > { %v1089_v58 = vpop.permute.xlu0 %1088 }
 0x6d5   : > { %v1094_v59 = vsel %vm614_vm3, %v1089_v58, 0 }
 0x6d6   : > { %1629 = vmatpush3.bf16.msra.mxu1 %v1094_v59 }
 0x6d7   : > { %1634 = vmatprep.subr.bf16.mxu1 %v1831_v8 }
 0x6db   : > { %v1762_v60 = vpop.eup %1761 }
 0x6dc   : > { %v1086_v62 = vmul.f32 %v1762_v60, %v1760_v48 }
 0x6de   : > { %v1087_v63 = vpack.c.bf16 %v1086_v62, %v1086_v62 }
 0x6e0   : > { %1631 = vmatmul.mubr.msk.bf16.vlgmr.msra.gmra.mrb[20].mxu1 %vm550_vm2, %v1087_v63 }
 0x6e1   : > { %1635 = vmatpush3.bf16.msra.mxu1 %v1142_v1  ;;  %1636 = vmatprep.mubr.msk.bf16.mxu1 %vm1832_vm1, %v1831_v8 }
 0x7b3   : > { %v1130_v2 = vpop.f32.mrb[20].mxu1 }
 0x7b4   : > { %v1136_v3 = vpack.c.bf16 %v1130_v2, %v1130_v2  ;;  %v1632_v4 = vpop.f32.mrb[21].mxu1 }
 0x7b5   : > { %v1133_v5 = vpop.f32.mrb[22].mxu1 }
 0x7b6   : > { %v1633_v6 = vpop.f32.mrb[23].mxu1  ;;  %1637 = vmatmul.mubr.msk.bf16.vlgmr.msra.gmra.mrb[12].mxu1 %vm550_vm2, %v1136_v3 }
 0x889   : > { %v1178_v10 = vpop.f32.mrb[12].mxu1 }
 0x88a   : > { %v2101_v11 = vadd.f32 %v1178_v10, %v546_v9  ;;  %v1638_v12 = vpop.f32.mrb[13].mxu1 }
 0x88b   : > { %v1181_v13 = vpop.f32.mrb[14].mxu1 }
 0x88c   : > { %v1639_v14 = vpop.f32.mrb[15].mxu1  ;;  %v1185_v15 = vsel %vm438_vm0, %v2101_v11, 0.0 }
 0x88d   : > { %1186 = vadd.xlane.f32.xlu1 %v1185_v15 }
 0x91a   : > { %v1187_v16 = vpop.xlane.xlu1 %1186 }
 0x91b   : > { %v1188_v17 = vmul.f32 0.03125, %v1187_v16 }
 0x91d   : > { %v1189_v18 = vsub.f32 %v2101_v11, %v1188_v17 }
 0x91f   : > { %v1190_v19 = vmul.f32 %v1189_v18, %v1189_v18 }
 0x921   : > { %v1191_v20 = vsel %vm438_vm0, %v1190_v19, 0.0 }
 0x922   : > { %1192 = vadd.xlane.f32.xlu0 %v1191_v20 }
 0x9af   : > { %v1193_v22 = vpop.xlane.xlu0 %1192 }
 0x9b0   : > { %v1194_v23 = vmul.f32 0.03125, %v1193_v22 }
 0x9b2   : > { %v1195_v24 = vadd.f32 1e-05, %v1194_v23 }
 0x9b4   : > { %1763 = vrsqrt.f32 %v1195_v24 }
 0x9be   : > { %v1764_v25 = vpop.eup %1763 }
 0x9bf   : > { %v1197_v28 = vmul.f32 %v1764_v25, %v1189_v18 }
 0x9c1   : > { %v1205_v30 = vmul.f32 %v1502_v27, %v1197_v28 }
 0x9c3   : > { %v1213_v31 = vadd.f32 %v1503_v29, %v1205_v30 }
 0x9c5   : > { %v1214_v32 = vpack.c.bf16 %v1213_v31, %v1213_v31 }
 0x9c7   : > { %1645 = vmatmul.mubr.msk.bf16.vlgmr.msra.gmra.mrb[16].mxu0 %vm438_vm0, %v1214_v32 }
 0x9c8   : > { %1664 = vmatprep.mubr.msk.bf16.mxu0 %vm1832_vm1, %v1831_v8  ;;  %1649 = vmatpush3.bf16.msra.mxu0 %v1737_v33 }
 0x9c9   : > { %1650 = vmatprep.subr.bf16.mxu0 %v1831_v8 }
 0x9cc   : > { %1651 = vmatpush3.bf16.msra.mxu0 %v1738_v34 }
 0x9cd   : > { %1652 = vmatprep.subr.bf16.mxu0 %v1831_v8 }
 0x9d0   : > { %1653 = vmatpush3.bf16.msra.mxu0 %v1739_v35 }
 0x9d1   : > { %1654 = vmatprep.subr.bf16.mxu0 %v1831_v8 }
 0x9d4   : > { %1655 = vmatpush3.bf16.msra.mxu0 %v1740_v36 }
 0x9d5   : > { %1656 = vmatprep.subr.bf16.mxu0 %v1831_v8 }
 0x9d8   : > { %1657 = vmatpush3.bf16.msra.mxu0 %v1741_v37 }
 0x9d9   : > { %1658 = vmatprep.subr.bf16.mxu0 %v1831_v8 }
 0x9dc   : > { %1659 = vmatpush3.bf16.msra.mxu0 %v1742_v38 }
 0x9dd   : > { %1660 = vmatprep.subr.bf16.mxu0 %v1831_v8 }
 0x9e0   : > { %1661 = vmatpush3.bf16.msra.mxu0 %v1743_v39 }
 0x9e1   : > { %1662 = vmatprep.subr.bf16.mxu0 %v1831_v8 }
 0x9e4   : > { %1663 = vmatpush3.bf16.msra.mxu0 %v1744_v40 }
 0xa9a   : > { %v1275_v42 = vpop.f32.mrb[16].mxu0 }
 0xa9b   : > { %v1276_v43 = vadd.f32 %v1504_v41, %v1275_v42  ;;  %v1646_v44 = vpop.f32.mrb[17].mxu0 }
 0xa9c   : > { %v1278_v45 = vpop.f32.mrb[18].mxu0 }
 0xa9d   : > { %v1281_v46 = vmul.f32 %v1276_v43, %v1276_v43  ;;  %v1647_v47 = vpop.f32.mrb[19].mxu0 }
 0xa9f   : > { %v1282_v48 = vmul.f32 %v1281_v46, %v1276_v43 }
 0xaa1   : > { %v1283_v49 = vmul.f32 0.044715, %v1282_v48 }
 0xaa3   : > { %v1284_v50 = vadd.f32 %v1283_v49, %v1276_v43 }
 0xaa5   : > { %v1285_v51 = vmul.f32 0.7978846, %v1284_v50 }
 0xaa7   : > { %1765 = vtanh.f32 %v1285_v51 }
 0xab1   : > { %v1766_v52 = vpop.eup %1765 }
 0xab2   : > { %v1287_v8 = vadd.f32 1.0, %v1766_v52 }
 0xab4   : > { %v1288_v53 = vmul.f32 0.5, %v1287_v8 }
 0xab6   : > { %v1289_v54 = vmul.f32 %v1288_v53, %v1276_v43 }
 0xab8   : > { %v1290_v55 = vpack.c.bf16 %v1289_v54, %v1289_v54 }
 0xaba   : > { %1665 = vmatmul.mubr.bf16.vlgmr.msra.gmra.mrb[20].mxu0 %v1290_v55 }
 0xb8d   : > { %v1396_v26 = vpop.f32.mrb[20].mxu0 }
 0xb8e   : > { %v1397_v57 = vadd.f32 %v1508_v56, %v1396_v26  ;;  %v1666_v58 = vpop.f32.mrb[21].mxu0 }
 0xb8f   : > { %v1399_v59 = vpop.f32.mrb[22].mxu0 }
 0xb90   : > { %v1402_v60 = vadd.f32 %v2101_v11, %v1397_v57  ;;  %v1667_v61 = vpop.f32.mrb[23].mxu0 }
 0xb92   : > { %1403 = vst.msk [vmem:[%s431_s23] sm:$0xff] %vm438_vm0, %v1402_v60 }
 0xb93   : > { %1780 = shalt.err (!%p1777_p3)
}
 0xb94   : > { %s1781_s0 = scalar_lea.hbm %s2167_s1, 128  ;;  %s1785_s23 = scalar_lea.hbm %s2223_s13, 256 }
 0xb95   : > { %p1782_p4 = scmp.ne.s32.totalorder %s2167_s1, %s1781_s0  ;;  %p1786_p9 = scmp.lt.u32.totalorder %s2167_s1, %s2223_s13 }
 0xb96   : > { %p1787_p10 = scmp.lt.u32.totalorder %s1785_s23, %s1781_s0  ;;  %p1789_p12 = scmp.lt.u32.totalorder %s1781_s0, %s2167_s1 }
 0xb97   : > { %p1783_p7 = pnand %p1782_p4, %p1953_p5 }
 0xb98   : > { %p1788_p11 = por %p1787_p10, %p1786_p9 }
 0xb99   : > { %p1784_p8 = pneg %p1783_p7 }
 0xb9a   : > { %p1790_p13 = por %p1789_p12, %p1788_p11 }
 0xb9c   : > { %p1791_p0 = pnand %p1790_p13, %p1784_p8 }
 0xb9e   : > { %1794 = shalt.err (!%p1791_p0)
}
 0xb9f   : > { %1681 = dma.vmem_to_hbm [thread:$0]  (%p1953_p5), %s2169_s24, 128, %s2167_s1, %s1405_s29  }
 0xba0 PF: > { %p1687_p1 = scmp.ge.s32.totalorder %s1829_s28, 2  ;;  %s1430_s2 = sand.u32 1, %s1817_s25  }
 0xba1   : > { %s1431_s16 = scalar_lea.sflag [#allocation3], %s1430_s2 }
 0xba2   : > { %p1684_p2 = pnand %p1687_p1, %p1957_p6 }
 0xba4   : > { %1812 = dma.done.wait (!%p1684_p2), %s1431_s16, 128  }
 0xba5   : > { %1814 = vsyncadd (!%p1684_p2), %s1431_s16, 4294967168  ;;  %p23_p3 = scmp.ge.s32.totalorder %s1940_s14, 4   ;;  %s2232_s25 = smov %s1821_s26 }
 0xba6   : > { %s2233_s26 = smov %s1825_s27  ;;  %s2234_s27 = smov %s1951_s17 }
 0xba7   : > { %s2235_s28 = smov %s1940_s14  ;;  %25 = sbr.rel (!%p23_p3) target bundleno = 7 (0x7), region = 107 }
 0xbae   :  { %1436 = vsyncpa [#allocation3], 1 }
 0xbaf   :  { %1438 = vsyncpa [#allocation3 + $0x1], 1 }

</bundles_post_ra>
